<compile_context>
chip_gen: v7x
topology: tpu7x:2x2x1
jax: 0.10.0
libtpu: 0.0.40
codegen_flags: <defaults>
</compile_context>

<pallas_src>
import functools

import jax
import jax.numpy as jnp
import numpy as np
from jax.experimental import pallas as pl
from jax.experimental.pallas import tpu as pltpu


def _round_up(a, b):
    return -(-a // b) * b


def _cdiv(a, b):
    return -(-a // b)


def _res3d_kernel(xm_ref, xh_ref, w_ref, b_ref, o_ref, slab_ref, *,
                  offsets, ts, tsi, center):
    """One (batch-pack, spatial-tile) step: fused 27-tap conv + bias + residual + ReLU."""
    halo_len = xh_ref.shape[2]
    nbc = o_ref.shape[1]

    # Stage main tile + halo into one contiguous slab (also the f32->bf16
    # staging point in the bf16 path).  This is the only intra-VMEM copy.
    slab_ref[:, :ts] = xm_ref[0].astype(slab_ref.dtype)
    slab_ref[:, ts:ts + halo_len] = xh_ref[0].astype(slab_ref.dtype)

    # Bias broadcast hoisted out of the chunk loop (bias is folded into the
    # accumulator init -> no broadcast-add in the tail).
    bias_tile = jnp.broadcast_to(b_ref[...], (nbc, tsi)).astype(jnp.float32)

    # Lane-chunked register accumulation: acc stays a handful of vregs no
    # matter how big TS is; 27 tiny accumulated MXU dots per chunk, fed
    # directly from lane-shifted slab slices (no pat matrix, no 27x stores).
    for j in range(ts // tsi):
        base = j * tsi
        acc = bias_tile
        for k, off in enumerate(offsets):
            lo = off + base
            acc = acc + jnp.dot(w_ref[k], slab_ref[:, lo:lo + tsi],
                                preferred_element_type=jnp.float32)
        # Residual = the center tap (the unshifted input itself), then ReLU.
        resid = slab_ref[:, center + base:center + base + tsi].astype(jnp.float32)
        o_ref[0, :, base:base + tsi] = jnp.maximum(acc + resid, 0.0).astype(o_ref.dtype)


def residual3d_block(x, weight, bias, *, tile_s=None, use_bf16=False):
    """relu(Conv3d(C, C, kernel_size=3, padding=1)(x) + x) for NCDHW input x."""
    n, c, d, h, w = x.shape
    assert weight.shape == (c, c, 3, 3, 3) and bias.shape == (c,)
    out_dtype = x.dtype

    dp, hp, wp = d + 2, h + 2, w + 2
    sp = dp * hp * wp

    # Tap (kd, kh, kw) of the 3x3x3 stencil == flat lane shift by `off` on the
    # padded grid (strides hp*wp, wp, 1); compute on the padded grid, crop below.
    offsets = tuple(kd * hp * wp + kh * wp + kw
                    for kd in range(3) for kh in range(3) for kw in range(3))
    halo = offsets[-1]                                  # 2*hp*wp + 2*wp + 2
    halo_pad = _round_up(halo, 128)

    # Batch packing: fold pairs of batches into the channel/sublane axis via a
    # pure metadata reshape (fills 8 f32 sublanes when C == 4).
    nb = 2 if (n % 2 == 0 and n >= 2) else 1
    nbc = nb * c

    stage_dtype = jnp.bfloat16 if use_bf16 else jnp.float32
    stage_bytes = jnp.dtype(stage_dtype).itemsize
    in_bytes = 2 if use_bf16 else x.dtype.itemsize
    out_bytes = jnp.dtype(out_dtype).itemsize

    # Spatial tile: cover as much of sp per step as a conservative VMEM budget
    # allows (40 MiB -- safe on v7x's 64 MiB physical, well under v5e/v6e's
    # 128 MiB), then shrink to keep >= 2 grid steps for 2-TensorCore chips.
    per_lane = nbc * (stage_bytes + 4 * in_bytes + 2 * out_bytes) + 1
    ts_cap = max(halo_pad, (40 * 2**20 // per_lane) // halo_pad * halo_pad)
    ts = min(_round_up(sp, halo_pad), ts_cap)
    if tile_s is not None:
        ts = max(halo_pad, min(ts, _round_up(tile_s, halo_pad)))
    if (n // nb) * _cdiv(sp, ts) < 2 and sp > halo_pad:
        ts = min(ts, _round_up(_cdiv(sp, 2), halo_pad))
    assert ts % halo_pad == 0, "spatial tile must be a multiple of the halo block"
    num_tiles = _cdiv(sp, ts)
    l_in = num_tiles * ts + halo_pad
    r = ts // halo_pad                                  # halo block-index stride

    # Lane chunk for the register accumulator (128-aligned divisor of ts).
    if ts <= 512:
        tsi = ts
    else:
        tsi = max(cand for cand in (128, 256, 512) if ts % cand == 0)

    # Padded, flattened, batch-packed input (one pad; reshapes are metadata-only).
    xg = x.reshape(n // nb, nbc, d, h, w)
    xp = jnp.pad(xg, ((0, 0), (0, 0), (1, 1), (1, 1), (1, 1)))
    xflat = jnp.pad(xp.reshape(n // nb, nbc, sp), ((0, 0), (0, 0), (0, l_in - sp)))
    if use_bf16:
        xflat = xflat.astype(jnp.bfloat16)
    # TODO(synk): when stacking several Residual3DBlocks, keep activations in this
    # flat padded layout between blocks and pad/crop once per network.

    # Per-tap weights, nb-way block-diagonal so one dot per tap covers all
    # packed batches: (27, nb*C, nb*C), tap order (kd, kh, kw).
    w_tap = jnp.transpose(weight, (2, 3, 4, 0, 1)).reshape(27, c, c)
    w_bd = jnp.einsum('kij,ab->kaibj', w_tap, jnp.eye(nb, dtype=w_tap.dtype))
    w_bd = w_bd.reshape(27, nbc, nbc).astype(stage_dtype)
    b_col = jnp.tile(bias, (nb,)).reshape(nbc, 1).astype(jnp.float32)

    kernel = functools.partial(_res3d_kernel, offsets=offsets, ts=ts, tsi=tsi,
                               center=offsets[13])      # (1,1,1) tap

    # Scoped-VMEM limit derived from the actual block footprint (double-buffered
    # inputs/outputs + slab + weights), clamped to a range valid on v5e..v7x.
    vmem_need = (nbc * (ts + halo_pad) * stage_bytes            # slab scratch
                 + 2 * nbc * (ts + halo_pad) * in_bytes          # dbuf main+halo in
                 + 2 * nbc * ts * out_bytes                      # dbuf out
                 + 2 * (27 * nbc * nbc * stage_bytes + nbc * 4)) # weights + bias
    vmem_limit = int(min(48 * 2**20, max(4 * vmem_need, 16 * 2**20)))

    out_flat = pl.pallas_call(
        kernel,
        out_shape=jax.ShapeDtypeStruct((n // nb, nbc, num_tiles * ts), out_dtype),
        grid_spec=pltpu.PrefetchScalarGridSpec(
            num_scalar_prefetch=0,
            grid=(n // nb, num_tiles),
            in_specs=[
                # main S-tile of the flat padded input
                pl.BlockSpec((1, nbc, ts), lambda b, t: (b, 0, t)),
                # halo: the next `halo_pad` lanes of the same array
                pl.BlockSpec((1, nbc, halo_pad), lambda b, t: (b, 0, (t + 1) * r)),
                # per-tap block-diagonal weights / bias: grid-invariant, resident
                pl.BlockSpec((27, nbc, nbc), lambda b, t: (0, 0, 0)),
                pl.BlockSpec((nbc, 1), lambda b, t: (0, 0)),
            ],
            out_specs=pl.BlockSpec((1, nbc, ts), lambda b, t: (b, 0, t)),
            scratch_shapes=[
                pltpu.VMEM((nbc, ts + halo_pad), stage_dtype),   # staged slab
            ],
        ),
        compiler_params=pltpu.CompilerParams(
            dimension_semantics=("parallel", "parallel"),
            vmem_limit_bytes=vmem_limit,
        ),
    )(xflat, xflat, w_bd, b_col)

    # Crop the padded-grid result and reshape straight back to NCDHW.
    out = out_flat[:, :, :sp].reshape(n, c, dp, hp, wp)[:, :, :d, :h, :w]
    return out


if __name__ == "__main__":
    key = jax.random.PRNGKey(0)
    kx, kwgt, kb = jax.random.split(key, 3)

    N, C, D, H, W = 2, 4, 8, 8, 8
    x = jax.random.normal(kx, (N, C, D, H, W), dtype=jnp.float32)

    # Deterministic synthetic parameters matching nn.Conv3d(C, C, kernel_size=3).
    fan_in = C * 3 * 3 * 3
    weight = jax.random.normal(kwgt, (C, C, 3, 3, 3), dtype=jnp.float32) / np.sqrt(fan_in)
    bias = jax.random.normal(kb, (C,), dtype=jnp.float32) * 0.1

    # Plain-JAX reference of the same forward pass.
    ref_conv = jax.lax.conv_general_dilated(
        x, weight, window_strides=(1, 1, 1),
        padding=((1, 1), (1, 1), (1, 1)),
        dimension_numbers=("NCDHW", "OIDHW", "NCDHW"),
        precision=jax.lax.Precision.HIGHEST)
    ref = jnp.maximum(ref_conv + bias[None, :, None, None, None] + x, 0.0)

    # f32 path (default).
    out = jax.block_until_ready(residual3d_block(x, weight, bias))
    assert out.shape == (N, C, D, H, W)
    np.testing.assert_allclose(np.asarray(out), np.asarray(ref), atol=2e-2, rtol=2e-2)

    # bf16-staged path (HBM/VMEM-bandwidth optimization; f32 accumulate + tail).
    out_bf16 = jax.block_until_ready(residual3d_block(x, weight, bias, use_bf16=True))
    np.testing.assert_allclose(np.asarray(out_bf16), np.asarray(ref), atol=5e-2, rtol=5e-2)

    print("KERNEL_OK")
</pallas_src>

<mosaic_0001>
module attributes {stable_mosaic.version = 11 : i64} {
  func.func @_res3d_kernel(%arg0: i32, %arg1: i32, %arg2: memref<1x8x512xf32, #tpu.memory_space<vmem>>, %arg3: memref<1x8x256xf32, #tpu.memory_space<vmem>>, %arg4: memref<27x8x8xf32, #tpu.memory_space<vmem>>, %arg5: memref<8x1xf32, #tpu.memory_space<vmem>>, %arg6: memref<1x8x512xf32, #tpu.memory_space<vmem>>, %arg7: memref<8x768xf32, #tpu.memory_space<vmem>>) attributes {dimension_semantics = [#tpu.dimension_semantics<parallel>, #tpu.dimension_semantics<parallel>], iteration_bounds = array<i64: 1, 2>, scalar_prefetch = 0 : i64, scratch_operands = 1 : i64, tpu.core_type = #tpu.core_type<tc>, window_params = [{transform_indices = @transform_0, window_bounds = array<i64: 1, 8, 512>}, {transform_indices = @transform_1, window_bounds = array<i64: 1, 8, 256>}, {pipeline_mode = #tpu.pipeline_mode<synchronous>, transform_indices = @transform_2, window_bounds = array<i64: 27, 8, 8>}, {pipeline_mode = #tpu.pipeline_mode<synchronous>, transform_indices = @transform_3, window_bounds = array<i64: 8, 1>}, {transform_indices = @transform_4, window_bounds = array<i64: 1, 8, 512>}]} {
    %c0 = arith.constant 0 : index
    %c0_0 = arith.constant 0 : index
    %c0_1 = arith.constant 0 : index
    %0 = vector.load %arg2[%c0, %c0_0, %c0_1] : memref<1x8x512xf32, #tpu.memory_space<vmem>>, vector<1x8x512xf32>
    %1 = vector.shape_cast %0 : vector<1x8x512xf32> to vector<8x512xf32>
    %c0_2 = arith.constant 0 : index
    %c0_3 = arith.constant 0 : index
    %2 = vector.load %arg7[%c0_2, %c0_3] : memref<8x768xf32, #tpu.memory_space<vmem>>, vector<8x512xf32>
    tpu.vector_store %arg7[%c0_2, %c0_3], %1 {strides = array<i32>} : memref<8x768xf32, #tpu.memory_space<vmem>>, vector<8x512xf32>,
    %c0_4 = arith.constant 0 : index
    %c0_5 = arith.constant 0 : index
    %c0_6 = arith.constant 0 : index
    %3 = vector.load %arg3[%c0_4, %c0_5, %c0_6] : memref<1x8x256xf32, #tpu.memory_space<vmem>>, vector<1x8x256xf32>
    %4 = vector.shape_cast %3 : vector<1x8x256xf32> to vector<8x256xf32>
    %c0_7 = arith.constant 0 : index
    %c512 = arith.constant 512 : index
    %5 = vector.load %arg7[%c0_7, %c512] : memref<8x768xf32, #tpu.memory_space<vmem>>, vector<8x256xf32>
    tpu.vector_store %arg7[%c0_7, %c512], %4 {strides = array<i32>} : memref<8x768xf32, #tpu.memory_space<vmem>>, vector<8x256xf32>,
    %c0_8 = arith.constant 0 : index
    %c0_9 = arith.constant 0 : index
    %6 = vector.load %arg5[%c0_8, %c0_9] : memref<8x1xf32, #tpu.memory_space<vmem>>, vector<8x1xf32>
    %7 = vector.shape_cast %6 : vector<8x1xf32> to vector<8x1xf32>
    %8 = vector.broadcast %7 : vector<8x1xf32> to vector<8x512xf32>
    %c0_10 = arith.constant 0 : index
    %c0_11 = arith.constant 0 : index
    %c0_12 = arith.constant 0 : index
    %9 = vector.load %arg4[%c0_10, %c0_11, %c0_12] : memref<27x8x8xf32, #tpu.memory_space<vmem>>, vector<1x8x8xf32>
    %10 = vector.shape_cast %9 : vector<1x8x8xf32> to vector<8x8xf32>
    %c0_13 = arith.constant 0 : index
    %c0_14 = arith.constant 0 : index
    %11 = vector.load %arg7[%c0_13, %c0_14] : memref<8x768xf32, #tpu.memory_space<vmem>>, vector<8x512xf32>
    %cst = arith.constant dense<0.000000e+00> : vector<8x512xf32>
    %12 = tpu.matmul %10, %11, %cst {dimension_numbers = #tpu.dot_dimension_numbers<[1], [0], [0], [1], [0, 0, 1, 1], [], []>} : vector<8x8xf32>, vector<8x512xf32>, vector<8x512xf32> -> vector<8x512xf32>
    %13 = arith.addf %8, %12 : vector<8x512xf32>
    %c1 = arith.constant 1 : index
    %c0_15 = arith.constant 0 : index
    %c0_16 = arith.constant 0 : index
    %14 = vector.load %arg4[%c1, %c0_15, %c0_16] : memref<27x8x8xf32, #tpu.memory_space<vmem>>, vector<1x8x8xf32>
    %15 = vector.shape_cast %14 : vector<1x8x8xf32> to vector<8x8xf32>
    %c0_17 = arith.constant 0 : index
    %c1_18 = arith.constant 1 : index
    %16 = vector.load %arg7[%c0_17, %c1_18] : memref<8x768xf32, #tpu.memory_space<vmem>>, vector<8x512xf32>
    %cst_19 = arith.constant dense<0.000000e+00> : vector<8x512xf32>
    %17 = tpu.matmul %15, %16, %cst_19 {dimension_numbers = #tpu.dot_dimension_numbers<[1], [0], [0], [1], [0, 0, 1, 1], [], []>} : vector<8x8xf32>, vector<8x512xf32>, vector<8x512xf32> -> vector<8x512xf32>
    %18 = arith.addf %13, %17 : vector<8x512xf32>
    %c2 = arith.constant 2 : index
    %c0_20 = arith.constant 0 : index
    %c0_21 = arith.constant 0 : index
    %19 = vector.load %arg4[%c2, %c0_20, %c0_21] : memref<27x8x8xf32, #tpu.memory_space<vmem>>, vector<1x8x8xf32>
    %20 = vector.shape_cast %19 : vector<1x8x8xf32> to vector<8x8xf32>
    %c0_22 = arith.constant 0 : index
    %c2_23 = arith.constant 2 : index
    %21 = vector.load %arg7[%c0_22, %c2_23] : memref<8x768xf32, #tpu.memory_space<vmem>>, vector<8x512xf32>
    %cst_24 = arith.constant dense<0.000000e+00> : vector<8x512xf32>
    %22 = tpu.matmul %20, %21, %cst_24 {dimension_numbers = #tpu.dot_dimension_numbers<[1], [0], [0], [1], [0, 0, 1, 1], [], []>} : vector<8x8xf32>, vector<8x512xf32>, vector<8x512xf32> -> vector<8x512xf32>
    %23 = arith.addf %18, %22 : vector<8x512xf32>
    %c3 = arith.constant 3 : index
    %c0_25 = arith.constant 0 : index
    %c0_26 = arith.constant 0 : index
    %24 = vector.load %arg4[%c3, %c0_25, %c0_26] : memref<27x8x8xf32, #tpu.memory_space<vmem>>, vector<1x8x8xf32>
    %25 = vector.shape_cast %24 : vector<1x8x8xf32> to vector<8x8xf32>
    %c0_27 = arith.constant 0 : index
    %c10 = arith.constant 10 : index
    %26 = vector.load %arg7[%c0_27, %c10] : memref<8x768xf32, #tpu.memory_space<vmem>>, vector<8x512xf32>
    %cst_28 = arith.constant dense<0.000000e+00> : vector<8x512xf32>
    %27 = tpu.matmul %25, %26, %cst_28 {dimension_numbers = #tpu.dot_dimension_numbers<[1], [0], [0], [1], [0, 0, 1, 1], [], []>} : vector<8x8xf32>, vector<8x512xf32>, vector<8x512xf32> -> vector<8x512xf32>
    %28 = arith.addf %23, %27 : vector<8x512xf32>
    %c4 = arith.constant 4 : index
    %c0_29 = arith.constant 0 : index
    %c0_30 = arith.constant 0 : index
    %29 = vector.load %arg4[%c4, %c0_29, %c0_30] : memref<27x8x8xf32, #tpu.memory_space<vmem>>, vector<1x8x8xf32>
    %30 = vector.shape_cast %29 : vector<1x8x8xf32> to vector<8x8xf32>
    %c0_31 = arith.constant 0 : index
    %c11 = arith.constant 11 : index
    %31 = vector.load %arg7[%c0_31, %c11] : memref<8x768xf32, #tpu.memory_space<vmem>>, vector<8x512xf32>
    %cst_32 = arith.constant dense<0.000000e+00> : vector<8x512xf32>
    %32 = tpu.matmul %30, %31, %cst_32 {dimension_numbers = #tpu.dot_dimension_numbers<[1], [0], [0], [1], [0, 0, 1, 1], [], []>} : vector<8x8xf32>, vector<8x512xf32>, vector<8x512xf32> -> vector<8x512xf32>
    %33 = arith.addf %28, %32 : vector<8x512xf32>
    %c5 = arith.constant 5 : index
    %c0_33 = arith.constant 0 : index
    %c0_34 = arith.constant 0 : index
    %34 = vector.load %arg4[%c5, %c0_33, %c0_34] : memref<27x8x8xf32, #tpu.memory_space<vmem>>, vector<1x8x8xf32>
    %35 = vector.shape_cast %34 : vector<1x8x8xf32> to vector<8x8xf32>
    %c0_35 = arith.constant 0 : index
    %c12 = arith.constant 12 : index
    %36 = vector.load %arg7[%c0_35, %c12] : memref<8x768xf32, #tpu.memory_space<vmem>>, vector<8x512xf32>
    %cst_36 = arith.constant dense<0.000000e+00> : vector<8x512xf32>
    %37 = tpu.matmul %35, %36, %cst_36 {dimension_numbers = #tpu.dot_dimension_numbers<[1], [0], [0], [1], [0, 0, 1, 1], [], []>} : vector<8x8xf32>, vector<8x512xf32>, vector<8x512xf32> -> vector<8x512xf32>
    %38 = arith.addf %33, %37 : vector<8x512xf32>
    %c6 = arith.constant 6 : index
    %c0_37 = arith.constant 0 : index
    %c0_38 = arith.constant 0 : index
    %39 = vector.load %arg4[%c6, %c0_37, %c0_38] : memref<27x8x8xf32, #tpu.memory_space<vmem>>, vector<1x8x8xf32>
    %40 = vector.shape_cast %39 : vector<1x8x8xf32> to vector<8x8xf32>
    %c0_39 = arith.constant 0 : index
    %c20 = arith.constant 20 : index
    %41 = vector.load %arg7[%c0_39, %c20] : memref<8x768xf32, #tpu.memory_space<vmem>>, vector<8x512xf32>
    %cst_40 = arith.constant dense<0.000000e+00> : vector<8x512xf32>
    %42 = tpu.matmul %40, %41, %cst_40 {dimension_numbers = #tpu.dot_dimension_numbers<[1], [0], [0], [1], [0, 0, 1, 1], [], []>} : vector<8x8xf32>, vector<8x512xf32>, vector<8x512xf32> -> vector<8x512xf32>
    %43 = arith.addf %38, %42 : vector<8x512xf32>
    %c7 = arith.constant 7 : index
    %c0_41 = arith.constant 0 : index
    %c0_42 = arith.constant 0 : index
    %44 = vector.load %arg4[%c7, %c0_41, %c0_42] : memref<27x8x8xf32, #tpu.memory_space<vmem>>, vector<1x8x8xf32>
    %45 = vector.shape_cast %44 : vector<1x8x8xf32> to vector<8x8xf32>
    %c0_43 = arith.constant 0 : index
    %c21 = arith.constant 21 : index
    %46 = vector.load %arg7[%c0_43, %c21] : memref<8x768xf32, #tpu.memory_space<vmem>>, vector<8x512xf32>
    %cst_44 = arith.constant dense<0.000000e+00> : vector<8x512xf32>
    %47 = tpu.matmul %45, %46, %cst_44 {dimension_numbers = #tpu.dot_dimension_numbers<[1], [0], [0], [1], [0, 0, 1, 1], [], []>} : vector<8x8xf32>, vector<8x512xf32>, vector<8x512xf32> -> vector<8x512xf32>
    %48 = arith.addf %43, %47 : vector<8x512xf32>
    %c8 = arith.constant 8 : index
    %c0_45 = arith.constant 0 : index
    %c0_46 = arith.constant 0 : index
    %49 = vector.load %arg4[%c8, %c0_45, %c0_46] : memref<27x8x8xf32, #tpu.memory_space<vmem>>, vector<1x8x8xf32>
    %50 = vector.shape_cast %49 : vector<1x8x8xf32> to vector<8x8xf32>
    %c0_47 = arith.constant 0 : index
    %c22 = arith.constant 22 : index
    %51 = vector.load %arg7[%c0_47, %c22] : memref<8x768xf32, #tpu.memory_space<vmem>>, vector<8x512xf32>
    %cst_48 = arith.constant dense<0.000000e+00> : vector<8x512xf32>
    %52 = tpu.matmul %50, %51, %cst_48 {dimension_numbers = #tpu.dot_dimension_numbers<[1], [0], [0], [1], [0, 0, 1, 1], [], []>} : vector<8x8xf32>, vector<8x512xf32>, vector<8x512xf32> -> vector<8x512xf32>
    %53 = arith.addf %48, %52 : vector<8x512xf32>
    %c9 = arith.constant 9 : index
    %c0_49 = arith.constant 0 : index
    %c0_50 = arith.constant 0 : index
    %54 = vector.load %arg4[%c9, %c0_49, %c0_50] : memref<27x8x8xf32, #tpu.memory_space<vmem>>, vector<1x8x8xf32>
    %55 = vector.shape_cast %54 : vector<1x8x8xf32> to vector<8x8xf32>
    %c0_51 = arith.constant 0 : index
    %c100 = arith.constant 100 : index
    %56 = vector.load %arg7[%c0_51, %c100] : memref<8x768xf32, #tpu.memory_space<vmem>>, vector<8x512xf32>
    %cst_52 = arith.constant dense<0.000000e+00> : vector<8x512xf32>
    %57 = tpu.matmul %55, %56, %cst_52 {dimension_numbers = #tpu.dot_dimension_numbers<[1], [0], [0], [1], [0, 0, 1, 1], [], []>} : vector<8x8xf32>, vector<8x512xf32>, vector<8x512xf32> -> vector<8x512xf32>
    %58 = arith.addf %53, %57 : vector<8x512xf32>
    %c10_53 = arith.constant 10 : index
    %c0_54 = arith.constant 0 : index
    %c0_55 = arith.constant 0 : index
    %59 = vector.load %arg4[%c10_53, %c0_54, %c0_55] : memref<27x8x8xf32, #tpu.memory_space<vmem>>, vector<1x8x8xf32>
    %60 = vector.shape_cast %59 : vector<1x8x8xf32> to vector<8x8xf32>
    %c0_56 = arith.constant 0 : index
    %c101 = arith.constant 101 : index
    %61 = vector.load %arg7[%c0_56, %c101] : memref<8x768xf32, #tpu.memory_space<vmem>>, vector<8x512xf32>
    %cst_57 = arith.constant dense<0.000000e+00> : vector<8x512xf32>
    %62 = tpu.matmul %60, %61, %cst_57 {dimension_numbers = #tpu.dot_dimension_numbers<[1], [0], [0], [1], [0, 0, 1, 1], [], []>} : vector<8x8xf32>, vector<8x512xf32>, vector<8x512xf32> -> vector<8x512xf32>
    %63 = arith.addf %58, %62 : vector<8x512xf32>
    %c11_58 = arith.constant 11 : index
    %c0_59 = arith.constant 0 : index
    %c0_60 = arith.constant 0 : index
    %64 = vector.load %arg4[%c11_58, %c0_59, %c0_60] : memref<27x8x8xf32, #tpu.memory_space<vmem>>, vector<1x8x8xf32>
    %65 = vector.shape_cast %64 : vector<1x8x8xf32> to vector<8x8xf32>
    %c0_61 = arith.constant 0 : index
    %c102 = arith.constant 102 : index
    %66 = vector.load %arg7[%c0_61, %c102] : memref<8x768xf32, #tpu.memory_space<vmem>>, vector<8x512xf32>
    %cst_62 = arith.constant dense<0.000000e+00> : vector<8x512xf32>
    %67 = tpu.matmul %65, %66, %cst_62 {dimension_numbers = #tpu.dot_dimension_numbers<[1], [0], [0], [1], [0, 0, 1, 1], [], []>} : vector<8x8xf32>, vector<8x512xf32>, vector<8x512xf32> -> vector<8x512xf32>
    %68 = arith.addf %63, %67 : vector<8x512xf32>
    %c12_63 = arith.constant 12 : index
    %c0_64 = arith.constant 0 : index
    %c0_65 = arith.constant 0 : index
    %69 = vector.load %arg4[%c12_63, %c0_64, %c0_65] : memref<27x8x8xf32, #tpu.memory_space<vmem>>, vector<1x8x8xf32>
    %70 = vector.shape_cast %69 : vector<1x8x8xf32> to vector<8x8xf32>
    %c0_66 = arith.constant 0 : index
    %c110 = arith.constant 110 : index
    %71 = vector.load %arg7[%c0_66, %c110] : memref<8x768xf32, #tpu.memory_space<vmem>>, vector<8x512xf32>
    %cst_67 = arith.constant dense<0.000000e+00> : vector<8x512xf32>
    %72 = tpu.matmul %70, %71, %cst_67 {dimension_numbers = #tpu.dot_dimension_numbers<[1], [0], [0], [1], [0, 0, 1, 1], [], []>} : vector<8x8xf32>, vector<8x512xf32>, vector<8x512xf32> -> vector<8x512xf32>
    %73 = arith.addf %68, %72 : vector<8x512xf32>
    %c13 = arith.constant 13 : index
    %c0_68 = arith.constant 0 : index
    %c0_69 = arith.constant 0 : index
    %74 = vector.load %arg4[%c13, %c0_68, %c0_69] : memref<27x8x8xf32, #tpu.memory_space<vmem>>, vector<1x8x8xf32>
    %75 = vector.shape_cast %74 : vector<1x8x8xf32> to vector<8x8xf32>
    %c0_70 = arith.constant 0 : index
    %c111 = arith.constant 111 : index
    %76 = vector.load %arg7[%c0_70, %c111] : memref<8x768xf32, #tpu.memory_space<vmem>>, vector<8x512xf32>
    %cst_71 = arith.constant dense<0.000000e+00> : vector<8x512xf32>
    %77 = tpu.matmul %75, %76, %cst_71 {dimension_numbers = #tpu.dot_dimension_numbers<[1], [0], [0], [1], [0, 0, 1, 1], [], []>} : vector<8x8xf32>, vector<8x512xf32>, vector<8x512xf32> -> vector<8x512xf32>
    %78 = arith.addf %73, %77 : vector<8x512xf32>
    %c14 = arith.constant 14 : index
    %c0_72 = arith.constant 0 : index
    %c0_73 = arith.constant 0 : index
    %79 = vector.load %arg4[%c14, %c0_72, %c0_73] : memref<27x8x8xf32, #tpu.memory_space<vmem>>, vector<1x8x8xf32>
    %80 = vector.shape_cast %79 : vector<1x8x8xf32> to vector<8x8xf32>
    %c0_74 = arith.constant 0 : index
    %c112 = arith.constant 112 : index
    %81 = vector.load %arg7[%c0_74, %c112] : memref<8x768xf32, #tpu.memory_space<vmem>>, vector<8x512xf32>
    %cst_75 = arith.constant dense<0.000000e+00> : vector<8x512xf32>
    %82 = tpu.matmul %80, %81, %cst_75 {dimension_numbers = #tpu.dot_dimension_numbers<[1], [0], [0], [1], [0, 0, 1, 1], [], []>} : vector<8x8xf32>, vector<8x512xf32>, vector<8x512xf32> -> vector<8x512xf32>
    %83 = arith.addf %78, %82 : vector<8x512xf32>
    %c15 = arith.constant 15 : index
    %c0_76 = arith.constant 0 : index
    %c0_77 = arith.constant 0 : index
    %84 = vector.load %arg4[%c15, %c0_76, %c0_77] : memref<27x8x8xf32, #tpu.memory_space<vmem>>, vector<1x8x8xf32>
    %85 = vector.shape_cast %84 : vector<1x8x8xf32> to vector<8x8xf32>
    %c0_78 = arith.constant 0 : index
    %c120 = arith.constant 120 : index
    %86 = vector.load %arg7[%c0_78, %c120] : memref<8x768xf32, #tpu.memory_space<vmem>>, vector<8x512xf32>
    %cst_79 = arith.constant dense<0.000000e+00> : vector<8x512xf32>
    %87 = tpu.matmul %85, %86, %cst_79 {dimension_numbers = #tpu.dot_dimension_numbers<[1], [0], [0], [1], [0, 0, 1, 1], [], []>} : vector<8x8xf32>, vector<8x512xf32>, vector<8x512xf32> -> vector<8x512xf32>
    %88 = arith.addf %83, %87 : vector<8x512xf32>
    %c16 = arith.constant 16 : index
    %c0_80 = arith.constant 0 : index
    %c0_81 = arith.constant 0 : index
    %89 = vector.load %arg4[%c16, %c0_80, %c0_81] : memref<27x8x8xf32, #tpu.memory_space<vmem>>, vector<1x8x8xf32>
    %90 = vector.shape_cast %89 : vector<1x8x8xf32> to vector<8x8xf32>
    %c0_82 = arith.constant 0 : index
    %c121 = arith.constant 121 : index
    %91 = vector.load %arg7[%c0_82, %c121] : memref<8x768xf32, #tpu.memory_space<vmem>>, vector<8x512xf32>
    %cst_83 = arith.constant dense<0.000000e+00> : vector<8x512xf32>
    %92 = tpu.matmul %90, %91, %cst_83 {dimension_numbers = #tpu.dot_dimension_numbers<[1], [0], [0], [1], [0, 0, 1, 1], [], []>} : vector<8x8xf32>, vector<8x512xf32>, vector<8x512xf32> -> vector<8x512xf32>
    %93 = arith.addf %88, %92 : vector<8x512xf32>
    %c17 = arith.constant 17 : index
    %c0_84 = arith.constant 0 : index
    %c0_85 = arith.constant 0 : index
    %94 = vector.load %arg4[%c17, %c0_84, %c0_85] : memref<27x8x8xf32, #tpu.memory_space<vmem>>, vector<1x8x8xf32>
    %95 = vector.shape_cast %94 : vector<1x8x8xf32> to vector<8x8xf32>
    %c0_86 = arith.constant 0 : index
    %c122 = arith.constant 122 : index
    %96 = vector.load %arg7[%c0_86, %c122] : memref<8x768xf32, #tpu.memory_space<vmem>>, vector<8x512xf32>
    %cst_87 = arith.constant dense<0.000000e+00> : vector<8x512xf32>
    %97 = tpu.matmul %95, %96, %cst_87 {dimension_numbers = #tpu.dot_dimension_numbers<[1], [0], [0], [1], [0, 0, 1, 1], [], []>} : vector<8x8xf32>, vector<8x512xf32>, vector<8x512xf32> -> vector<8x512xf32>
    %98 = arith.addf %93, %97 : vector<8x512xf32>
    %c18 = arith.constant 18 : index
    %c0_88 = arith.constant 0 : index
    %c0_89 = arith.constant 0 : index
    %99 = vector.load %arg4[%c18, %c0_88, %c0_89] : memref<27x8x8xf32, #tpu.memory_space<vmem>>, vector<1x8x8xf32>
    %100 = vector.shape_cast %99 : vector<1x8x8xf32> to vector<8x8xf32>
    %c0_90 = arith.constant 0 : index
    %c200 = arith.constant 200 : index
    %101 = vector.load %arg7[%c0_90, %c200] : memref<8x768xf32, #tpu.memory_space<vmem>>, vector<8x512xf32>
    %cst_91 = arith.constant dense<0.000000e+00> : vector<8x512xf32>
    %102 = tpu.matmul %100, %101, %cst_91 {dimension_numbers = #tpu.dot_dimension_numbers<[1], [0], [0], [1], [0, 0, 1, 1], [], []>} : vector<8x8xf32>, vector<8x512xf32>, vector<8x512xf32> -> vector<8x512xf32>
    %103 = arith.addf %98, %102 : vector<8x512xf32>
    %c19 = arith.constant 19 : index
    %c0_92 = arith.constant 0 : index
    %c0_93 = arith.constant 0 : index
    %104 = vector.load %arg4[%c19, %c0_92, %c0_93] : memref<27x8x8xf32, #tpu.memory_space<vmem>>, vector<1x8x8xf32>
    %105 = vector.shape_cast %104 : vector<1x8x8xf32> to vector<8x8xf32>
    %c0_94 = arith.constant 0 : index
    %c201 = arith.constant 201 : index
    %106 = vector.load %arg7[%c0_94, %c201] : memref<8x768xf32, #tpu.memory_space<vmem>>, vector<8x512xf32>
    %cst_95 = arith.constant dense<0.000000e+00> : vector<8x512xf32>
    %107 = tpu.matmul %105, %106, %cst_95 {dimension_numbers = #tpu.dot_dimension_numbers<[1], [0], [0], [1], [0, 0, 1, 1], [], []>} : vector<8x8xf32>, vector<8x512xf32>, vector<8x512xf32> -> vector<8x512xf32>
    %108 = arith.addf %103, %107 : vector<8x512xf32>
    %c20_96 = arith.constant 20 : index
    %c0_97 = arith.constant 0 : index
    %c0_98 = arith.constant 0 : index
    %109 = vector.load %arg4[%c20_96, %c0_97, %c0_98] : memref<27x8x8xf32, #tpu.memory_space<vmem>>, vector<1x8x8xf32>
    %110 = vector.shape_cast %109 : vector<1x8x8xf32> to vector<8x8xf32>
    %c0_99 = arith.constant 0 : index
    %c202 = arith.constant 202 : index
    %111 = vector.load %arg7[%c0_99, %c202] : memref<8x768xf32, #tpu.memory_space<vmem>>, vector<8x512xf32>
    %cst_100 = arith.constant dense<0.000000e+00> : vector<8x512xf32>
    %112 = tpu.matmul %110, %111, %cst_100 {dimension_numbers = #tpu.dot_dimension_numbers<[1], [0], [0], [1], [0, 0, 1, 1], [], []>} : vector<8x8xf32>, vector<8x512xf32>, vector<8x512xf32> -> vector<8x512xf32>
    %113 = arith.addf %108, %112 : vector<8x512xf32>
    %c21_101 = arith.constant 21 : index
    %c0_102 = arith.constant 0 : index
    %c0_103 = arith.constant 0 : index
    %114 = vector.load %arg4[%c21_101, %c0_102, %c0_103] : memref<27x8x8xf32, #tpu.memory_space<vmem>>, vector<1x8x8xf32>
    %115 = vector.shape_cast %114 : vector<1x8x8xf32> to vector<8x8xf32>
    %c0_104 = arith.constant 0 : index
    %c210 = arith.constant 210 : index
    %116 = vector.load %arg7[%c0_104, %c210] : memref<8x768xf32, #tpu.memory_space<vmem>>, vector<8x512xf32>
    %cst_105 = arith.constant dense<0.000000e+00> : vector<8x512xf32>
    %117 = tpu.matmul %115, %116, %cst_105 {dimension_numbers = #tpu.dot_dimension_numbers<[1], [0], [0], [1], [0, 0, 1, 1], [], []>} : vector<8x8xf32>, vector<8x512xf32>, vector<8x512xf32> -> vector<8x512xf32>
    %118 = arith.addf %113, %117 : vector<8x512xf32>
    %c22_106 = arith.constant 22 : index
    %c0_107 = arith.constant 0 : index
    %c0_108 = arith.constant 0 : index
    %119 = vector.load %arg4[%c22_106, %c0_107, %c0_108] : memref<27x8x8xf32, #tpu.memory_space<vmem>>, vector<1x8x8xf32>
    %120 = vector.shape_cast %119 : vector<1x8x8xf32> to vector<8x8xf32>
    %c0_109 = arith.constant 0 : index
    %c211 = arith.constant 211 : index
    %121 = vector.load %arg7[%c0_109, %c211] : memref<8x768xf32, #tpu.memory_space<vmem>>, vector<8x512xf32>
    %cst_110 = arith.constant dense<0.000000e+00> : vector<8x512xf32>
    %122 = tpu.matmul %120, %121, %cst_110 {dimension_numbers = #tpu.dot_dimension_numbers<[1], [0], [0], [1], [0, 0, 1, 1], [], []>} : vector<8x8xf32>, vector<8x512xf32>, vector<8x512xf32> -> vector<8x512xf32>
    %123 = arith.addf %118, %122 : vector<8x512xf32>
    %c23 = arith.constant 23 : index
    %c0_111 = arith.constant 0 : index
    %c0_112 = arith.constant 0 : index
    %124 = vector.load %arg4[%c23, %c0_111, %c0_112] : memref<27x8x8xf32, #tpu.memory_space<vmem>>, vector<1x8x8xf32>
    %125 = vector.shape_cast %124 : vector<1x8x8xf32> to vector<8x8xf32>
    %c0_113 = arith.constant 0 : index
    %c212 = arith.constant 212 : index
    %126 = vector.load %arg7[%c0_113, %c212] : memref<8x768xf32, #tpu.memory_space<vmem>>, vector<8x512xf32>
    %cst_114 = arith.constant dense<0.000000e+00> : vector<8x512xf32>
    %127 = tpu.matmul %125, %126, %cst_114 {dimension_numbers = #tpu.dot_dimension_numbers<[1], [0], [0], [1], [0, 0, 1, 1], [], []>} : vector<8x8xf32>, vector<8x512xf32>, vector<8x512xf32> -> vector<8x512xf32>
    %128 = arith.addf %123, %127 : vector<8x512xf32>
    %c24 = arith.constant 24 : index
    %c0_115 = arith.constant 0 : index
    %c0_116 = arith.constant 0 : index
    %129 = vector.load %arg4[%c24, %c0_115, %c0_116] : memref<27x8x8xf32, #tpu.memory_space<vmem>>, vector<1x8x8xf32>
    %130 = vector.shape_cast %129 : vector<1x8x8xf32> to vector<8x8xf32>
    %c0_117 = arith.constant 0 : index
    %c220 = arith.constant 220 : index
    %131 = vector.load %arg7[%c0_117, %c220] : memref<8x768xf32, #tpu.memory_space<vmem>>, vector<8x512xf32>
    %cst_118 = arith.constant dense<0.000000e+00> : vector<8x512xf32>
    %132 = tpu.matmul %130, %131, %cst_118 {dimension_numbers = #tpu.dot_dimension_numbers<[1], [0], [0], [1], [0, 0, 1, 1], [], []>} : vector<8x8xf32>, vector<8x512xf32>, vector<8x512xf32> -> vector<8x512xf32>
    %133 = arith.addf %128, %132 : vector<8x512xf32>
    %c25 = arith.constant 25 : index
    %c0_119 = arith.constant 0 : index
    %c0_120 = arith.constant 0 : index
    %134 = vector.load %arg4[%c25, %c0_119, %c0_120] : memref<27x8x8xf32, #tpu.memory_space<vmem>>, vector<1x8x8xf32>
    %135 = vector.shape_cast %134 : vector<1x8x8xf32> to vector<8x8xf32>
    %c0_121 = arith.constant 0 : index
    %c221 = arith.constant 221 : index
    %136 = vector.load %arg7[%c0_121, %c221] : memref<8x768xf32, #tpu.memory_space<vmem>>, vector<8x512xf32>
    %cst_122 = arith.constant dense<0.000000e+00> : vector<8x512xf32>
    %137 = tpu.matmul %135, %136, %cst_122 {dimension_numbers = #tpu.dot_dimension_numbers<[1], [0], [0], [1], [0, 0, 1, 1], [], []>} : vector<8x8xf32>, vector<8x512xf32>, vector<8x512xf32> -> vector<8x512xf32>
    %138 = arith.addf %133, %137 : vector<8x512xf32>
    %c26 = arith.constant 26 : index
    %c0_123 = arith.constant 0 : index
    %c0_124 = arith.constant 0 : index
    %139 = vector.load %arg4[%c26, %c0_123, %c0_124] : memref<27x8x8xf32, #tpu.memory_space<vmem>>, vector<1x8x8xf32>
    %140 = vector.shape_cast %139 : vector<1x8x8xf32> to vector<8x8xf32>
    %c0_125 = arith.constant 0 : index
    %c222 = arith.constant 222 : index
    %141 = vector.load %arg7[%c0_125, %c222] : memref<8x768xf32, #tpu.memory_space<vmem>>, vector<8x512xf32>
    %cst_126 = arith.constant dense<0.000000e+00> : vector<8x512xf32>
    %142 = tpu.matmul %140, %141, %cst_126 {dimension_numbers = #tpu.dot_dimension_numbers<[1], [0], [0], [1], [0, 0, 1, 1], [], []>} : vector<8x8xf32>, vector<8x512xf32>, vector<8x512xf32> -> vector<8x512xf32>
    %143 = arith.addf %138, %142 : vector<8x512xf32>
    %c0_127 = arith.constant 0 : index
    %c111_128 = arith.constant 111 : index
    %144 = vector.load %arg7[%c0_127, %c111_128] : memref<8x768xf32, #tpu.memory_space<vmem>>, vector<8x512xf32>
    %145 = arith.addf %143, %144 : vector<8x512xf32>
    %cst_129 = arith.constant 0.000000e+00 : f32
    %146 = vector.broadcast %cst_129 : f32 to vector<8x512xf32>
    %147 = arith.maximumf %145, %146 : vector<8x512xf32>
    %c0_130 = arith.constant 0 : index
    %c0_131 = arith.constant 0 : index
    %c0_132 = arith.constant 0 : index
    %148 = vector.load %arg6[%c0_130, %c0_131, %c0_132] : memref<1x8x512xf32, #tpu.memory_space<vmem>>, vector<1x8x512xf32>
    %149 = vector.shape_cast %148 : vector<1x8x512xf32> to vector<8x512xf32>
    %150 = vector.shape_cast %147 : vector<8x512xf32> to vector<1x8x512xf32>
    tpu.vector_store %arg6[%c0_130, %c0_131, %c0_132], %150 {strides = array<i32>} : memref<1x8x512xf32, #tpu.memory_space<vmem>>, vector<1x8x512xf32>,
    return
  }
  func.func @transform_0(%arg0: i32, %arg1: i32) -> (i32, i32, i32) {
    %c0_i32 = arith.constant 0 : i32
    %c0_i32_0 = arith.constant 0 : i32
    return %arg0, %c0_i32, %arg1 : i32, i32, i32
  }
  func.func @transform_1(%arg0: i32, %arg1: i32) -> (i32, i32, i32) {
    %c1_i32 = arith.constant 1 : i32
    %0 = arith.addi %arg1, %c1_i32 : i32
    %c2_i32 = arith.constant 2 : i32
    %1 = arith.muli %0, %c2_i32 : i32
    %c0_i32 = arith.constant 0 : i32
    %c0_i32_0 = arith.constant 0 : i32
    return %arg0, %c0_i32, %1 : i32, i32, i32
  }
  func.func @transform_2(%arg0: i32, %arg1: i32) -> (i32, i32, i32) {
    %c0_i32 = arith.constant 0 : i32
    %c0_i32_0 = arith.constant 0 : i32
    %c0_i32_1 = arith.constant 0 : i32
    %c0_i32_2 = arith.constant 0 : i32
    return %c0_i32, %c0_i32_0, %c0_i32_1 : i32, i32, i32
  }
  func.func @transform_3(%arg0: i32, %arg1: i32) -> (i32, i32) {
    %c0_i32 = arith.constant 0 : i32
    %c0_i32_0 = arith.constant 0 : i32
    %c0_i32_1 = arith.constant 0 : i32
    return %c0_i32, %c0_i32_0 : i32, i32
  }
  func.func @transform_4(%arg0: i32, %arg1: i32) -> (i32, i32, i32) {
    %c0_i32 = arith.constant 0 : i32
    %c0_i32_0 = arith.constant 0 : i32
    return %arg0, %c0_i32, %arg1 : i32, i32, i32
  }
}

</mosaic_0001>

<bundles_post_ra>
// kernel: tpu_custom_call.1
= control target key start
LH: loop header
LB: loop body
LE: loop exit
PB: predicated region body
PF: predicated region fallthrough
CT: control target
= control target key end

     0   :  { %9 = vsyncpa [#allocation4], 0  ;;  %s6018_s0 = inlined_call_operand.vmem [shape: f32[1,8,1280], index: 0, kind: input, shape index: {}]   ;;  %s6019_s1 = inlined_call_operand.vmem [shape: f32[1,8,1280], index: 1, kind: input, shape index: {}]   ;;  %s6020_s2 = inlined_call_operand.vmem [shape: f32[27,8,8], index: 2, kind: input, shape index: {}]   ;;  %s6021_s3 = inlined_call_operand.vmem [shape: f32[8,1], index: 3, kind: input, shape index: {}]   ;;  %s6022_s4 = inlined_call_operand.hbm [shape: f32[1,8,1024], index: 4, kind: output, shape index: {}]  }
   0x1   :  { %11 = vsyncpa [#allocation4 + $0x1], 0  ;;  %s5466_s15 = smov 0   ;;  %s5468_s16 = smov 0  }
   0x2   :  { %s5470_s17 = smov 0   ;;  %s5472_s18 = smov 0  }
   0x3   :  { %s5474_s19 = smov 0   ;;  %s5476_s20 = smov 0  }
   0x4 LB: > { %s5032_s21 = sadd.s32 4294967295, %s5410_s20   ;;  %s5033_s22 = sadd.s32 4294967294, %s5410_s20   ;;  %s5410_s20 = sphi %s5476_s20, %s17_s20   ;;  %s5406_s19 = sphi %s5474_s19, %s6029_s19   ;;  %s5402_s18 = sphi %s5472_s18, %s6028_s18   ;;  %s5398_s17 = sphi %s5470_s17, %s6027_s17   ;;  %s5394_s16 = sphi %s5468_s16, %s6026_s16   ;;  %s5390_s15 = sphi %s5466_s15, %s6025_s15  }
   0x5   : > { %s26_s23 = sadd.s32 1, %s5406_s19  ;;  %s140_s24 = sadd.s32 1, %s5398_s17 }
   0x6   : > { %p27_p0 = scmp.ge.s32.totalorder %s26_s23, 2  ;;  %p150_p1 = scmp.ne.s32.totalorder %s5398_s17, %s5394_s16 }
   0x7   : > { %p151_p2 = scmp.eq.s32.totalorder %s5032_s21, 1  ;;  %p156_p3 = scmp.ne.s32.totalorder %s5394_s16, %s5390_s15 }
   0x8   : > { %s6031_s23 = smov (%p27_p0, %s26_s23), 0  ;;  %p157_p5 = scmp.eq.s32.totalorder %s5033_s22, 1 }
   0x9   : > { %p5506_p4 = por %p151_p2, %p150_p1  ;;  %s136_s26 = ssub.s32 %s5406_s19, %s6031_s23 }
   0xa   : > { %p5038_p6 = scmp.ge.s32.totalorder %s5410_s20, 1  ;;  %p138_p7 = scmp.eq.s32.totalorder %s136_s26, 0 }
   0xb   : > { %p5513_p8 = por %p157_p5, %p156_p3  ;;  %p219_p9 = scmp.lt.s32.totalorder %s5410_s20, 3 }
   0xc   : > { %s5519_s28 = scalar_select %p138_p7, %s5398_s17, %s140_s24  }
   0xd   : > { %p220_p10 = pnand %p5038_p6, %p219_p9 }
   0xe   : > { %s5040_s29 = sshll.u32 (!%p220_p10), %s5402_s18, 2  ;;  %v5412_v0 = vmov (!%p220_p10), 0.0   ;;  %s5413_s9 = smov (!%p220_p10), 127   ;;  %v315_v3 = vld [vmem:[%s6020_s2] sm:$0xff] (!%p220_p10)  ;;  %vm320_vm0 = vcmask (!%p220_p10), 64512   ;;  %vm492_vm1 = vcmask (!%p220_p10), 1039360  }
   0xf   : > { %223 = sbr.rel (%p220_p10) target bundleno = 634 (0x27a), region = 36  ;;  %p271_p11 = scmp.lt.s32.totalorder (!%p220_p10), %s5040_s29, 9  ;;  %388 = vmatprep.mubr.f32.mxu0 (!%p220_p10), %v5412_v0  ;;  %459 = vmatprep.mubr.f32.mxu1 (!%p220_p10), %v5412_v0  ;;  %v5047_v16 = vld [vmem:[%s6020_s2 + $0x8] sm:$0xff] (!%p220_p10)  ;;  %vm662_vm2 = vcmask (!%p220_p10), 1031168   ;;  %vm832_vm3 = vcmask (!%p220_p10), 965632   ;;  %v5050_v25 = vld [vmem:[%s6020_s2 + $0x10] sm:$0xff] (!%p220_p10) }
  0x10   : > { %s5139_s30 = sadd.s32 (!%p220_p10), 4, %s5040_s29  ;;  %s5414_s22 = smov (!%p220_p10), 126   ;;  %v5053_v34 = vld [vmem:[%s6020_s2 + $0x18] sm:$0xff] (!%p220_p10)  ;;  %vm1002_vm4 = vcmask (!%p220_p10), 957440   ;;  %vm1172_vm5 = vcmask (!%p220_p10), 949248   ;;  %v5056_v45 = vld [vmem:[%s6020_s2 + $0x20] sm:$0xff] (!%p220_p10) }
  0x11   : > { %p287_p12 = scmp.lt.s32.totalorder (!%p220_p10), %s5139_s30, 9  ;;  %s5415_s24 = smov (!%p220_p10), 118   ;;  %v5059_v54 = vld [vmem:[%s6020_s2 + $0x28] sm:$0xff] (!%p220_p10)  ;;  %vm1342_vm6 = vcmask (!%p220_p10), 883712   ;;  %vm1512_vm7 = vcmask (!%p220_p10), 875520   ;;  %vm1682_vm8 = vcmask (!%p220_p10), 867328  }
  0x12   : > { %s5416_s26 = smov (!%p220_p10), 117   ;;  %s5420_s6 = smov (!%p220_p10), 106   ;;  %vm1852_vm9 = vcmask (!%p220_p10), 228352   ;;  %vm2022_vm10 = vcmask (!%p220_p10), 220160   ;;  %vm2192_vm11 = vcmask (!%p220_p10), 211968   ;;  %vm2362_vm12 = vcmask (!%p220_p10), 146432  }
  0x13   : > { %s5421_s7 = smov (!%p220_p10), 28   ;;  %s5424_s10 = smov (!%p220_p10), 18   ;;  %vm2532_vm13 = vcmask (!%p220_p10), 138240   ;;  %vm2702_vm14 = vcmask (!%p220_p10), 130048   ;;  %vm3041_vm15 = vcmask (!%p220_p10), 56320  }
  0x14   : > { %s5425_s11 = smov (!%p220_p10), 17   ;;  %s5426_s14 = smov (!%p220_p10), 16  }
  0x15   : > { %s5436_s13 = smov (!%p220_p10), 36  }
  0x16   : > { %s6033_s29 = smov (!%p271_p11, %s5040_s29), 9  ;;  %s6035_s30 = smov (!%p287_p12, %s5139_s30), 9 }
  0x17   : > { %s5041_s5 = sshll.u32 %s6033_s29, 3  ;;  %s5044_s12 = sshll.u32 %s6035_s30, 3 }
  0x18   : > { %s276_s8 = scalar_lea.vmem %s6018_s0, %s5041_s5  ;;  %s5545_s21 = scalar_lea.vmem %s6019_s1, %s5044_s12 }
  0x19   : > { %v5527_v1 = vld [vmem:[%s276_s8 + $0x18] sm:$0xff]  ;;  %v5529_v2 = vld [vmem:[%s276_s8 + $0x8] sm:$0xff]  ;;  %v5536_v4 = vld [vmem:[%s276_s8 + $0x10] sm:$0xff]  ;;  %s5417_s29 = smov 116   ;;  %s5418_s30 = smov 108  }
  0x1a   : > { %488 = vrot.lane.b32.xlu1 %v5527_v1, %s5413_s9  ;;  %484 = vrot.lane.b32.xlu0 %v5529_v2, %s5413_s9  ;;  %v5538_v5 = vld [vmem:[%s276_s8] sm:$0xff]  ;;  %s5419_s5 = smov 107   ;;  %s5422_s8 = smov 27  }
  0x1b   : > { %324 = vmatprep.subr.mxu0 %v5529_v2  ;;  %395 = vmatprep.subr.mxu1 %v5527_v1  ;;  %v5554_v6 = vld [vmem:[%s5545_s21] sm:$0xff] }
  0x1c   : > { %325 = vmatpush1.msra.mxu0 %v5538_v5  ;;  %396 = vmatpush1.msra.mxu1 %v5536_v4 }
  0x1d   : > { %5045 = vmatmul.mubr.msk.f32.vlgmr.msra.gmra.mrb[0].mxu0 %vm320_vm0, %v315_v3  ;;  %5046 = vmatmul.mubr.msk.f32.vlgmr.msra.gmra.mrb[0].mxu1 %vm320_vm0, %v315_v3 }
  0x1e   : > { %654 = vrot.lane.b32.xlu1 %v5529_v2, %s5414_s22  ;;  %486 = vrot.lane.b32.xlu0 %v5536_v4, %s5413_s9 }
  0x1f   : > { %568 = vmatprep.mubr.f32.mxu0 %v5412_v0  ;;  %639 = vmatprep.mubr.f32.mxu1 %v5412_v0 }
  0x22   : > { %490 = vrot.lane.b32.xlu1 %v5554_v6, %s5413_s9  ;;  %482 = vrot.lane.b32.xlu0 %v5538_v5, %s5413_s9  ;;  %s5423_s9 = smov 26  }
  0x26   : > { %658 = vrot.lane.b32.xlu1 %v5527_v1, %s5414_s22  ;;  %656 = vrot.lane.b32.xlu0 %v5536_v4, %s5414_s22 }
  0x2a   : > { %652 = vrot.lane.b32.xlu1 %v5538_v5, %s5414_s22  ;;  %660 = vrot.lane.b32.xlu0 %v5554_v6, %s5414_s22  ;;  %s5437_s22 = smov 35  }
  0x2e   : > { %826 = vrot.lane.b32.xlu1 %v5536_v4, %s5415_s24  ;;  %824 = vrot.lane.b32.xlu0 %v5529_v2, %s5415_s24 }
  0x32   : > { %830 = vrot.lane.b32.xlu1 %v5554_v6, %s5415_s24  ;;  %828 = vrot.lane.b32.xlu0 %v5527_v1, %s5415_s24 }
  0x36   : > { %994 = vrot.lane.b32.xlu1 %v5529_v2, %s5416_s26  ;;  %822 = vrot.lane.b32.xlu0 %v5538_v5, %s5415_s24  ;;  %s5432_s24 = smov 54  }
  0x3a   : > { %998 = vrot.lane.b32.xlu1 %v5527_v1, %s5416_s26  ;;  %996 = vrot.lane.b32.xlu0 %v5536_v4, %s5416_s26 }
  0x3e   : > { %992 = vrot.lane.b32.xlu1 %v5538_v5, %s5416_s26  ;;  %1000 = vrot.lane.b32.xlu0 %v5554_v6, %s5416_s26  ;;  %s5427_s26 = smov 8  }
  0x42   : > { %1166 = vrot.lane.b32.xlu1 %v5536_v4, %s5417_s29  ;;  %1164 = vrot.lane.b32.xlu0 %v5529_v2, %s5417_s29 }
  0x46   : > { %1170 = vrot.lane.b32.xlu1 %v5554_v6, %s5417_s29  ;;  %1168 = vrot.lane.b32.xlu0 %v5527_v1, %s5417_s29 }
  0x4a   : > { %1334 = vrot.lane.b32.xlu1 %v5529_v2, %s5418_s30  ;;  %1162 = vrot.lane.b32.xlu0 %v5538_v5, %s5417_s29  ;;  %s5438_s29 = smov 34  }
  0x4e   : > { %1338 = vrot.lane.b32.xlu1 %v5527_v1, %s5418_s30  ;;  %1336 = vrot.lane.b32.xlu0 %v5536_v4, %s5418_s30 }
  0x52   : > { %1332 = vrot.lane.b32.xlu1 %v5538_v5, %s5418_s30  ;;  %1340 = vrot.lane.b32.xlu0 %v5554_v6, %s5418_s30  ;;  %s5433_s30 = smov 46  }
  0x56   : > { %1506 = vrot.lane.b32.xlu1 %v5536_v4, %s5419_s5  ;;  %1504 = vrot.lane.b32.xlu0 %v5529_v2, %s5419_s5 }
  0x5a   : > { %1510 = vrot.lane.b32.xlu1 %v5554_v6, %s5419_s5  ;;  %1508 = vrot.lane.b32.xlu0 %v5527_v1, %s5419_s5 }
  0x5e   : > { %1674 = vrot.lane.b32.xlu1 %v5529_v2, %s5420_s6  ;;  %1502 = vrot.lane.b32.xlu0 %v5538_v5, %s5419_s5  ;;  %s5428_s5 = smov 7  }
  0x62   : > { %1678 = vrot.lane.b32.xlu1 %v5527_v1, %s5420_s6  ;;  %1676 = vrot.lane.b32.xlu0 %v5536_v4, %s5420_s6 }
  0x66   : > { %1672 = vrot.lane.b32.xlu1 %v5538_v5, %s5420_s6  ;;  %1680 = vrot.lane.b32.xlu0 %v5554_v6, %s5420_s6 }
  0x6a   : > { %1846 = vrot.lane.b32.xlu1 %v5536_v4, %s5421_s7  ;;  %1844 = vrot.lane.b32.xlu0 %v5529_v2, %s5421_s7 }
  0x6e   : > { %1850 = vrot.lane.b32.xlu1 %v5554_v6, %s5421_s7  ;;  %1848 = vrot.lane.b32.xlu0 %v5527_v1, %s5421_s7 }
  0x72   : > { %2014 = vrot.lane.b32.xlu1 %v5529_v2, %s5422_s8  ;;  %1842 = vrot.lane.b32.xlu0 %v5538_v5, %s5421_s7  ;;  %s5434_s7 = smov 45  }
  0x76   : > { %2018 = vrot.lane.b32.xlu1 %v5527_v1, %s5422_s8  ;;  %2016 = vrot.lane.b32.xlu0 %v5536_v4, %s5422_s8 }
  0x7a   : > { %2012 = vrot.lane.b32.xlu1 %v5538_v5, %s5422_s8  ;;  %2020 = vrot.lane.b32.xlu0 %v5554_v6, %s5422_s8  ;;  %s5429_s8 = smov 6  }
  0x7e   : > { %2186 = vrot.lane.b32.xlu1 %v5536_v4, %s5423_s9  ;;  %2184 = vrot.lane.b32.xlu0 %v5529_v2, %s5423_s9 }
  0x82   : > { %2190 = vrot.lane.b32.xlu1 %v5554_v6, %s5423_s9  ;;  %2188 = vrot.lane.b32.xlu0 %v5527_v1, %s5423_s9 }
  0x86   : > { %2354 = vrot.lane.b32.xlu1 %v5529_v2, %s5424_s10  ;;  %2182 = vrot.lane.b32.xlu0 %v5538_v5, %s5423_s9  ;;  %s5440_s9 = smov [#allocation3]  }
  0x8a   : > { %2358 = vrot.lane.b32.xlu1 %v5527_v1, %s5424_s10  ;;  %2356 = vrot.lane.b32.xlu0 %v5536_v4, %s5424_s10 }
  0x8c   : > { %v489_v7 = vpop.permute.xlu1 %488  ;;  %v485_v8 = vpop.permute.xlu0 %484 }
  0x8e   : > { %2352 = vrot.lane.b32.xlu1 %v5538_v5, %s5424_s10  ;;  %2360 = vrot.lane.b32.xlu0 %v5554_v6, %s5424_s10  ;;  %s5435_s10 = smov 44  }
  0x90   : > { %v655_v9 = vpop.permute.xlu1 %654  ;;  %v487_v10 = vpop.permute.xlu0 %486 }
  0x91   : > { %v494_v11 = vsel %vm492_vm1, %v485_v8, %v487_v10  ;;  %v495_v17 = vsel %vm492_vm1, %v487_v10, %v489_v7  ;;  %v5705_v10 = vld [vmem:[%s5545_s21 + $0x8] sm:$0xff]  ;;  %s5431_s21 = smov 55  }
  0x92   : > { %2526 = vrot.lane.b32.xlu1 %v5536_v4, %s5425_s11  ;;  %2524 = vrot.lane.b32.xlu0 %v5529_v2, %s5425_s11 }
  0x93   : > { %504 = vmatprep.subr.mxu0 %v494_v11 }
  0x94   : > { %v491_v12 = vpop.permute.xlu1 %490  ;;  %v483_v13 = vpop.permute.xlu0 %482 }
  0x95   : > { %v493_v14 = vsel %vm492_vm1, %v483_v13, %v485_v8  ;;  %v496_v15 = vsel %vm492_vm1, %v489_v7, %v491_v12  ;;  %v5062_v7 = vld [vmem:[%s6020_s2 + $0x30] sm:$0xff]  ;;  %vm3211_vm1 = vcmask 48128  }
  0x96   : > { %575 = vmatprep.subr.mxu1 %v496_v15  ;;  %2530 = vrot.lane.b32.xlu1 %v5554_v6, %s5425_s11 }
  0x97   : > { %2528 = vrot.lane.b32.xlu0 %v5527_v1, %s5425_s11  ;;  %505 = vmatpush1.msra.mxu0 %v493_v14 }
  0x98   : > { %576 = vmatpush1.msra.mxu1 %v495_v17  ;;  %v659_v18 = vpop.permute.xlu1 %658  ;;  %v657_v19 = vpop.permute.xlu0 %656  ;;  %5048 = vmatmul.mubr.msk.f32.vlgmr.msra.gmra.mrb[0].mxu0 %vm320_vm0, %v5047_v16 }
  0x99   : > { %v664_v20 = vsel %vm662_vm2, %v655_v9, %v657_v19  ;;  %5049 = vmatmul.mubr.msk.f32.vlgmr.msra.gmra.mrb[0].mxu1 %vm320_vm0, %v5047_v16  ;;  %738 = vmatprep.mubr.f32.mxu0 %v5412_v0  ;;  %v665_v26 = vsel %vm662_vm2, %v657_v19, %v659_v18  ;;  %v5065_v16 = vld [vmem:[%s6020_s2 + $0x38] sm:$0xff] }
  0x9a   : > { %2694 = vrot.lane.b32.xlu1 %v5529_v2, %s5426_s14  ;;  %674 = vmatprep.subr.mxu0 %v664_v20 }
  0x9b   : > { %2522 = vrot.lane.b32.xlu0 %v5538_v5, %s5425_s11  ;;  %809 = vmatprep.mubr.f32.mxu1 %v5412_v0  ;;  %s5430_s11 = smov 56  }
  0x9c   : > { %v653_v21 = vpop.permute.xlu1 %652  ;;  %v661_v22 = vpop.permute.xlu0 %660 }
  0x9d   : > { %v663_v23 = vsel %vm662_vm2, %v653_v21, %v655_v9  ;;  %v666_v24 = vsel %vm662_vm2, %v659_v18, %v661_v22  ;;  %vm3391_vm2 = vcmask 457728  }
  0x9e   : > { %2698 = vrot.lane.b32.xlu1 %v5527_v1, %s5426_s14  ;;  %675 = vmatpush1.msra.mxu0 %v663_v23 }
  0x9f   : > { %2696 = vrot.lane.b32.xlu0 %v5536_v4, %s5426_s14  ;;  %745 = vmatprep.subr.mxu1 %v666_v24 }
  0xa0   : > { %746 = vmatpush1.msra.mxu1 %v665_v26  ;;  %v827_v27 = vpop.permute.xlu1 %826  ;;  %v825_v28 = vpop.permute.xlu0 %824  ;;  %5051 = vmatmul.mubr.msk.f32.vlgmr.msra.gmra.mrb[0].mxu0 %vm320_vm0, %v5050_v25 }
  0xa1   : > { %v834_v29 = vsel %vm832_vm3, %v825_v28, %v827_v27  ;;  %5052 = vmatmul.mubr.msk.f32.vlgmr.msra.gmra.mrb[0].mxu1 %vm320_vm0, %v5050_v25  ;;  %908 = vmatprep.mubr.f32.mxu0 %v5412_v0 }
  0xa2   : > { %2692 = vrot.lane.b32.xlu1 %v5538_v5, %s5426_s14  ;;  %844 = vmatprep.subr.mxu0 %v834_v29 }
  0xa3   : > { %2700 = vrot.lane.b32.xlu0 %v5554_v6, %s5426_s14  ;;  %979 = vmatprep.mubr.f32.mxu1 %v5412_v0 }
  0xa4   : > { %v831_v30 = vpop.permute.xlu1 %830  ;;  %v829_v31 = vpop.permute.xlu0 %828 }
  0xa5   : > { %v836_v32 = vsel %vm832_vm3, %v829_v31, %v831_v30  ;;  %v835_v33 = vsel %vm832_vm3, %v827_v27, %v829_v31  ;;  %v5068_v27 = vld [vmem:[%s6020_s2 + $0x40] sm:$0xff] }
  0xa6   : > { %2866 = vrot.lane.b32.xlu1 %v5536_v4, %s5427_s26  ;;  %915 = vmatprep.subr.mxu1 %v836_v32 }
  0xa7   : > { %2864 = vrot.lane.b32.xlu0 %v5529_v2, %s5427_s26  ;;  %916 = vmatpush1.msra.mxu1 %v835_v33 }
  0xa8   : > { %v995_v35 = vpop.permute.xlu1 %994  ;;  %v823_v36 = vpop.permute.xlu0 %822 }
  0xa9   : > { %v833_v37 = vsel %vm832_vm3, %v823_v36, %v825_v28  ;;  %5055 = vmatmul.mubr.msk.f32.vlgmr.msra.gmra.mrb[0].mxu1 %vm320_vm0, %v5053_v34  ;;  %v5071_v36 = vld [vmem:[%s6020_s2 + $0x48] sm:$0xff]  ;;  %vm3561_vm3 = vcmask 449536  }
  0xaa   : > { %2870 = vrot.lane.b32.xlu1 %v5554_v6, %s5427_s26  ;;  %845 = vmatpush1.msra.mxu0 %v833_v37 }
  0xab   : > { %2868 = vrot.lane.b32.xlu0 %v5527_v1, %s5427_s26  ;;  %5054 = vmatmul.mubr.msk.f32.vlgmr.msra.gmra.mrb[0].mxu0 %vm320_vm0, %v5053_v34 }
  0xac   : > { %v999_v38 = vpop.permute.xlu1 %998  ;;  %v997_v39 = vpop.permute.xlu0 %996  ;;  %1149 = vmatprep.mubr.f32.mxu1 %v5412_v0  ;;  %1078 = vmatprep.mubr.f32.mxu0 %v5412_v0 }
  0xad   : > { %v1004_v40 = vsel %vm1002_vm4, %v995_v35, %v997_v39  ;;  %v1005_v46 = vsel %vm1002_vm4, %v997_v39, %v999_v38 }
  0xae   : > { %3033 = vrot.lane.b32.xlu1 %v5529_v2, %s5428_s5  ;;  %1014 = vmatprep.subr.mxu0 %v1004_v40 }
  0xaf   : > { %2862 = vrot.lane.b32.xlu0 %v5538_v5, %s5427_s26  ;;  %s5137_s26 = sshll.u32 %s5402_s18, 9 }
  0xb0   : > { %v993_v41 = vpop.permute.xlu1 %992  ;;  %v1001_v42 = vpop.permute.xlu0 %1000 }
  0xb1   : > { %v1003_v43 = vsel %vm1002_vm4, %v993_v41, %v995_v35  ;;  %v1006_v44 = vsel %vm1002_vm4, %v999_v38, %v1001_v42  ;;  %vm3731_vm4 = vcmask 441344  }
  0xb2   : > { %3037 = vrot.lane.b32.xlu1 %v5527_v1, %s5428_s5  ;;  %1015 = vmatpush1.msra.mxu0 %v1003_v43 }
  0xb3   : > { %3035 = vrot.lane.b32.xlu0 %v5536_v4, %s5428_s5  ;;  %1085 = vmatprep.subr.mxu1 %v1006_v44 }
  0xb4   : > { %1086 = vmatpush1.msra.mxu1 %v1005_v46  ;;  %v1167_v47 = vpop.permute.xlu1 %1166  ;;  %v1165_v48 = vpop.permute.xlu0 %1164  ;;  %5057 = vmatmul.mubr.msk.f32.vlgmr.msra.gmra.mrb[0].mxu0 %vm320_vm0, %v5056_v45 }
  0xb5   : > { %v1174_v49 = vsel %vm1172_vm5, %v1165_v48, %v1167_v47  ;;  %5058 = vmatmul.mubr.msk.f32.vlgmr.msra.gmra.mrb[0].mxu1 %vm320_vm0, %v5056_v45  ;;  %1248 = vmatprep.mubr.f32.mxu0 %v5412_v0 }
  0xb6   : > { %3031 = vrot.lane.b32.xlu1 %v5538_v5, %s5428_s5  ;;  %1184 = vmatprep.subr.mxu0 %v1174_v49 }
  0xb7   : > { %3039 = vrot.lane.b32.xlu0 %v5554_v6, %s5428_s5  ;;  %1319 = vmatprep.mubr.f32.mxu1 %v5412_v0 }
  0xb8   : > { %v1171_v50 = vpop.permute.xlu1 %1170  ;;  %v1169_v51 = vpop.permute.xlu0 %1168 }
  0xb9   : > { %v1176_v52 = vsel %vm1172_vm5, %v1169_v51, %v1171_v50  ;;  %v1175_v53 = vsel %vm1172_vm5, %v1167_v47, %v1169_v51  ;;  %v5074_v47 = vld [vmem:[%s6020_s2 + $0x50] sm:$0xff] }
  0xba   : > { %3205 = vrot.lane.b32.xlu1 %v5536_v4, %s5429_s8  ;;  %1255 = vmatprep.subr.mxu1 %v1176_v52 }
  0xbb   : > { %3203 = vrot.lane.b32.xlu0 %v5529_v2, %s5429_s8  ;;  %1256 = vmatpush1.msra.mxu1 %v1175_v53 }
  0xbc   : > { %v1335_v55 = vpop.permute.xlu1 %1334  ;;  %v1163_v56 = vpop.permute.xlu0 %1162 }
  0xbd   : > { %v1173_v57 = vsel %vm1172_vm5, %v1163_v56, %v1165_v48  ;;  %5061 = vmatmul.mubr.msk.f32.vlgmr.msra.gmra.mrb[0].mxu1 %vm320_vm0, %v5059_v54  ;;  %v5077_v56 = vld [vmem:[%s6020_s2 + $0x58] sm:$0xff]  ;;  %vm3901_vm5 = vcmask 375808  }
  0xbe   : > { %3209 = vrot.lane.b32.xlu1 %v5554_v6, %s5429_s8  ;;  %1185 = vmatpush1.msra.mxu0 %v1173_v57 }
  0xbf   : > { %3207 = vrot.lane.b32.xlu0 %v5527_v1, %s5429_s8  ;;  %5060 = vmatmul.mubr.msk.f32.vlgmr.msra.gmra.mrb[0].mxu0 %vm320_vm0, %v5059_v54 }
  0xc0   : > { %v1339_v58 = vpop.permute.xlu1 %1338  ;;  %v1337_v59 = vpop.permute.xlu0 %1336  ;;  %1489 = vmatprep.mubr.f32.mxu1 %v5412_v0  ;;  %1418 = vmatprep.mubr.f32.mxu0 %v5412_v0 }
  0xc1   : > { %v1344_v60 = vsel %vm1342_vm6, %v1335_v55, %v1337_v59  ;;  %v1345_v8 = vsel %vm1342_vm6, %v1337_v59, %v1339_v58 }
  0xc2   : > { %3383 = vrot.lane.b32.xlu1 %v5536_v4, %s5430_s11  ;;  %1354 = vmatprep.subr.mxu0 %v1344_v60 }
  0xc3   : > { %3201 = vrot.lane.b32.xlu0 %v5538_v5, %s5429_s8 }
  0xc4   : > { %v1333_v61 = vpop.permute.xlu1 %1332  ;;  %v1341_v62 = vpop.permute.xlu0 %1340 }
  0xc5   : > { %v1343_v63 = vsel %vm1342_vm6, %v1333_v61, %v1335_v55  ;;  %v1346_v3 = vsel %vm1342_vm6, %v1339_v58, %v1341_v62  ;;  %vm4071_vm6 = vcmask 367616  }
  0xc6   : > { %3387 = vrot.lane.b32.xlu1 %v5554_v6, %s5430_s11  ;;  %1355 = vmatpush1.msra.mxu0 %v1343_v63 }
  0xc7   : > { %3385 = vrot.lane.b32.xlu0 %v5527_v1, %s5430_s11  ;;  %1425 = vmatprep.subr.mxu1 %v1346_v3 }
  0xc8   : > { %1426 = vmatpush1.msra.mxu1 %v1345_v8  ;;  %v1507_v5 = vpop.permute.xlu1 %1506  ;;  %v1505_v9 = vpop.permute.xlu0 %1504  ;;  %5063 = vmatmul.mubr.msk.f32.vlgmr.msra.gmra.mrb[0].mxu0 %vm320_vm0, %v5062_v7 }
  0xc9   : > { %v1514_v11 = vsel %vm1512_vm7, %v1505_v9, %v1507_v5  ;;  %5064 = vmatmul.mubr.msk.f32.vlgmr.msra.gmra.mrb[0].mxu1 %vm320_vm0, %v5062_v7  ;;  %1588 = vmatprep.mubr.f32.mxu0 %v5412_v0 }
  0xca   : > { %3381 = vrot.lane.b32.xlu1 %v5529_v2, %s5430_s11  ;;  %1524 = vmatprep.subr.mxu0 %v1514_v11 }
  0xcb   : > { %3389 = vrot.lane.b32.xlu0 %v5705_v10, %s5430_s11  ;;  %1659 = vmatprep.mubr.f32.mxu1 %v5412_v0 }
  0xcc   : > { %v1511_v12 = vpop.permute.xlu1 %1510  ;;  %v1509_v13 = vpop.permute.xlu0 %1508 }
  0xcd   : > { %v1516_v14 = vsel %vm1512_vm7, %v1509_v13, %v1511_v12  ;;  %v1515_v15 = vsel %vm1512_vm7, %v1507_v5, %v1509_v13  ;;  %v5080_v5 = vld [vmem:[%s6020_s2 + $0x60] sm:$0xff] }
  0xce   : > { %3555 = vrot.lane.b32.xlu1 %v5527_v1, %s5431_s21  ;;  %1595 = vmatprep.subr.mxu1 %v1516_v14 }
  0xcf   : > { %3553 = vrot.lane.b32.xlu0 %v5536_v4, %s5431_s21  ;;  %1596 = vmatpush1.msra.mxu1 %v1515_v15 }
  0xd0   : > { %v1675_v17 = vpop.permute.xlu1 %1674  ;;  %v1503_v18 = vpop.permute.xlu0 %1502 }
  0xd1   : > { %v1513_v19 = vsel %vm1512_vm7, %v1503_v18, %v1505_v9  ;;  %5067 = vmatmul.mubr.msk.f32.vlgmr.msra.gmra.mrb[0].mxu1 %vm320_vm0, %v5065_v16  ;;  %v5083_v18 = vld [vmem:[%s6020_s2 + $0x68] sm:$0xff]  ;;  %vm4241_vm7 = vcmask 359424  }
  0xd2   : > { %3559 = vrot.lane.b32.xlu1 %v5705_v10, %s5431_s21  ;;  %1525 = vmatpush1.msra.mxu0 %v1513_v19 }
  0xd3   : > { %3557 = vrot.lane.b32.xlu0 %v5554_v6, %s5431_s21  ;;  %5066 = vmatmul.mubr.msk.f32.vlgmr.msra.gmra.mrb[0].mxu0 %vm320_vm0, %v5065_v16 }
  0xd4   : > { %v1679_v20 = vpop.permute.xlu1 %1678  ;;  %v1677_v21 = vpop.permute.xlu0 %1676  ;;  %1829 = vmatprep.mubr.f32.mxu1 %v5412_v0  ;;  %1758 = vmatprep.mubr.f32.mxu0 %v5412_v0 }
  0xd5   : > { %v1684_v22 = vsel %vm1682_vm8, %v1675_v17, %v1677_v21  ;;  %v1685_v28 = vsel %vm1682_vm8, %v1677_v21, %v1679_v20 }
  0xd6   : > { %3723 = vrot.lane.b32.xlu1 %v5536_v4, %s5432_s24  ;;  %1694 = vmatprep.subr.mxu0 %v1684_v22 }
  0xd7   : > { %3551 = vrot.lane.b32.xlu0 %v5529_v2, %s5431_s21 }
  0xd8   : > { %v1673_v23 = vpop.permute.xlu1 %1672  ;;  %v1681_v24 = vpop.permute.xlu0 %1680 }
  0xd9   : > { %v1683_v25 = vsel %vm1682_vm8, %v1673_v23, %v1675_v17  ;;  %v1686_v26 = vsel %vm1682_vm8, %v1679_v20, %v1681_v24  ;;  %vm4411_vm8 = vcmask 293888  }
  0xda   : > { %3727 = vrot.lane.b32.xlu1 %v5554_v6, %s5432_s24  ;;  %1695 = vmatpush1.msra.mxu0 %v1683_v25  ;;  %v5439_v25 = vmov 0  }
  0xdb   : > { %3725 = vrot.lane.b32.xlu0 %v5527_v1, %s5432_s24  ;;  %1765 = vmatprep.subr.mxu1 %v1686_v26 }
  0xdc   : > { %1766 = vmatpush1.msra.mxu1 %v1685_v28  ;;  %v1847_v29 = vpop.permute.xlu1 %1846  ;;  %v1845_v30 = vpop.permute.xlu0 %1844  ;;  %5069 = vmatmul.mubr.msk.f32.vlgmr.msra.gmra.mrb[0].mxu0 %vm320_vm0, %v5068_v27 }
  0xdd   : > { %v1854_v31 = vsel %vm1852_vm9, %v1845_v30, %v1847_v29  ;;  %5070 = vmatmul.mubr.msk.f32.vlgmr.msra.gmra.mrb[0].mxu1 %vm320_vm0, %v5068_v27  ;;  %1928 = vmatprep.mubr.f32.mxu0 %v5412_v0 }
  0xde   : > { %3721 = vrot.lane.b32.xlu1 %v5529_v2, %s5432_s24  ;;  %1864 = vmatprep.subr.mxu0 %v1854_v31 }
  0xdf   : > { %3729 = vrot.lane.b32.xlu0 %v5705_v10, %s5432_s24  ;;  %1999 = vmatprep.mubr.f32.mxu1 %v5412_v0 }
  0xe0   : > { %v1851_v32 = vpop.permute.xlu1 %1850  ;;  %v1849_v33 = vpop.permute.xlu0 %1848  ;;  %5331 = vset.pattern.permute.xlu0 %v5439_v25 }
  0xe1   : > { %v1855_v34 = vsel %vm1852_vm9, %v1847_v29, %v1849_v33  ;;  %v1856_v35 = vsel %vm1852_vm9, %v1849_v33, %v1851_v32  ;;  %v309_v33 = vld [vmem:[%s6021_s3] sm:$0xff] }
  0xe2   : > { %3895 = vrot.lane.b32.xlu1 %v5527_v1, %s5433_s30  ;;  %1935 = vmatprep.subr.mxu1 %v1856_v35 }
  0xe3   : > { %3893 = vrot.lane.b32.xlu0 %v5536_v4, %s5433_s30  ;;  %1936 = vmatpush1.msra.mxu1 %v1855_v34 }
  0xe4   : > { %v2015_v37 = vpop.permute.xlu1 %2014  ;;  %v1843_v38 = vpop.permute.xlu0 %1842 }
  0xe5   : > { %v1853_v39 = vsel %vm1852_vm9, %v1843_v38, %v1845_v30  ;;  %5073 = vmatmul.mubr.msk.f32.vlgmr.msra.gmra.mrb[0].mxu1 %vm320_vm0, %v5071_v36  ;;  %vm4581_vm9 = vcmask 285696  }
  0xe6   : > { %3899 = vrot.lane.b32.xlu1 %v5705_v10, %s5433_s30  ;;  %1865 = vmatpush1.msra.mxu0 %v1853_v39 }
  0xe7   : > { %3897 = vrot.lane.b32.xlu0 %v5554_v6, %s5433_s30  ;;  %5072 = vmatmul.mubr.msk.f32.vlgmr.msra.gmra.mrb[0].mxu0 %vm320_vm0, %v5071_v36 }
  0xe8   : > { %v2019_v40 = vpop.permute.xlu1 %2018  ;;  %v2017_v41 = vpop.permute.xlu0 %2016  ;;  %2169 = vmatprep.mubr.f32.mxu1 %v5412_v0  ;;  %2098 = vmatprep.mubr.f32.mxu0 %v5412_v0 }
  0xe9   : > { %v2024_v42 = vsel %vm2022_vm10, %v2015_v37, %v2017_v41  ;;  %v2025_v48 = vsel %vm2022_vm10, %v2017_v41, %v2019_v40 }
  0xea   : > { %4063 = vrot.lane.b32.xlu1 %v5536_v4, %s5434_s7  ;;  %2034 = vmatprep.subr.mxu0 %v2024_v42 }
  0xeb   : > { %3891 = vrot.lane.b32.xlu0 %v5529_v2, %s5433_s30 }
  0xec   : > { %v2013_v43 = vpop.permute.xlu1 %2012  ;;  %v2021_v44 = vpop.permute.xlu0 %2020 }
  0xed   : > { %v2023_v45 = vsel %vm2022_vm10, %v2013_v43, %v2015_v37  ;;  %v2026_v46 = vsel %vm2022_vm10, %v2019_v40, %v2021_v44  ;;  %vm4751_vm10 = vcmask 277504  }
  0xee   : > { %4067 = vrot.lane.b32.xlu1 %v5554_v6, %s5434_s7  ;;  %2035 = vmatpush1.msra.mxu0 %v2023_v45 }
  0xef   : > { %4065 = vrot.lane.b32.xlu0 %v5527_v1, %s5434_s7  ;;  %2105 = vmatprep.subr.mxu1 %v2026_v46  ;;  %v5092_v46 = vld [vmem:[%s6020_s2 + $0x80] sm:$0xff] }
  0xf0   : > { %2106 = vmatpush1.msra.mxu1 %v2025_v48  ;;  %v2187_v49 = vpop.permute.xlu1 %2186  ;;  %v2185_v50 = vpop.permute.xlu0 %2184  ;;  %5075 = vmatmul.mubr.msk.f32.vlgmr.msra.gmra.mrb[0].mxu0 %vm320_vm0, %v5074_v47 }
  0xf1   : > { %v2194_v51 = vsel %vm2192_vm11, %v2185_v50, %v2187_v49  ;;  %5076 = vmatmul.mubr.msk.f32.vlgmr.msra.gmra.mrb[0].mxu1 %vm320_vm0, %v5074_v47  ;;  %2268 = vmatprep.mubr.f32.mxu0 %v5412_v0 }
  0xf2   : > { %4061 = vrot.lane.b32.xlu1 %v5529_v2, %s5434_s7  ;;  %2204 = vmatprep.subr.mxu0 %v2194_v51 }
  0xf3   : > { %4069 = vrot.lane.b32.xlu0 %v5705_v10, %s5434_s7  ;;  %2339 = vmatprep.mubr.f32.mxu1 %v5412_v0  ;;  %s5971_s7 = scalar_lea.hbm %s6022_s4, %s5137_s26 }
  0xf4   : > { %v2191_v52 = vpop.permute.xlu1 %2190  ;;  %v2189_v53 = vpop.permute.xlu0 %2188 }
  0xf5   : > { %v2195_v54 = vsel %vm2192_vm11, %v2187_v49, %v2189_v53  ;;  %v2196_v55 = vsel %vm2192_vm11, %v2189_v53, %v2191_v52 }
  0xf6   : > { %4235 = vrot.lane.b32.xlu1 %v5527_v1, %s5435_s10  ;;  %2275 = vmatprep.subr.mxu1 %v2196_v55  ;;  %v5095_v55 = vld [vmem:[%s6020_s2 + $0x88] sm:$0xff] }
  0xf7   : > { %4233 = vrot.lane.b32.xlu0 %v5536_v4, %s5435_s10  ;;  %2276 = vmatpush1.msra.mxu1 %v2195_v54 }
  0xf8   : > { %v2355_v57 = vpop.permute.xlu1 %2354  ;;  %v2183_v58 = vpop.permute.xlu0 %2182 }
  0xf9   : > { %v2193_v59 = vsel %vm2192_vm11, %v2183_v58, %v2185_v50  ;;  %5079 = vmatmul.mubr.msk.f32.vlgmr.msra.gmra.mrb[0].mxu1 %vm320_vm0, %v5077_v56 }
  0xfa   : > { %4239 = vrot.lane.b32.xlu1 %v5705_v10, %s5435_s10  ;;  %2205 = vmatpush1.msra.mxu0 %v2193_v59 }
  0xfb   : > { %4237 = vrot.lane.b32.xlu0 %v5554_v6, %s5435_s10  ;;  %5078 = vmatmul.mubr.msk.f32.vlgmr.msra.gmra.mrb[0].mxu0 %vm320_vm0, %v5077_v56 }
  0xfc   : > { %v2359_v60 = vpop.permute.xlu1 %2358  ;;  %v2357_v61 = vpop.permute.xlu0 %2356  ;;  %2509 = vmatprep.mubr.f32.mxu1 %v5412_v0  ;;  %2438 = vmatprep.mubr.f32.mxu0 %v5412_v0 }
  0xfd   : > { %v2364_v62 = vsel %vm2362_vm12, %v2355_v57, %v2357_v61  ;;  %v2365_v9 = vsel %vm2362_vm12, %v2357_v61, %v2359_v60 }
  0xfe   : > { %4403 = vrot.lane.b32.xlu1 %v5536_v4, %s5436_s13  ;;  %2374 = vmatprep.subr.mxu0 %v2364_v62 }
  0xff   : > { %4231 = vrot.lane.b32.xlu0 %v5529_v2, %s5435_s10  ;;  %s5336_s10 = sshll.u32 %s5440_s9, 4  ;;  %s5337_s10 = int_to_ptr.vmem [resolvable:$false] %s5336_s10 }
 0x100   : > { %v2353_v63 = vpop.permute.xlu1 %2352  ;;  %v2361_v3 = vpop.permute.xlu0 %2360  ;;  %s5338_s11 = scalar_lea.vmem %s5337_s10, 1024 }
 0x101   : > { %v2363_v7 = vsel %vm2362_vm12, %v2353_v63, %v2355_v57  ;;  %v2366_v8 = vsel %vm2362_vm12, %v2359_v60, %v2361_v3 }
 0x102   : > { %4407 = vrot.lane.b32.xlu1 %v5554_v6, %s5436_s13  ;;  %2375 = vmatpush1.msra.mxu0 %v2363_v7 }
 0x103   : > { %4405 = vrot.lane.b32.xlu0 %v5527_v1, %s5436_s13  ;;  %2445 = vmatprep.subr.mxu1 %v2366_v8  ;;  %v5098_v8 = vld [vmem:[%s6020_s2 + $0x90] sm:$0xff] }
 0x104   : > { %2446 = vmatpush1.msra.mxu1 %v2365_v9  ;;  %v2527_v11 = vpop.permute.xlu1 %2526  ;;  %v2525_v12 = vpop.permute.xlu0 %2524  ;;  %5081 = vmatmul.mubr.msk.f32.vlgmr.msra.gmra.mrb[0].mxu0 %vm320_vm0, %v5080_v5 }
 0x105   : > { %v5805_v13 = vsel %vm2532_vm13, %v2525_v12, %v2527_v11  ;;  %5082 = vmatmul.mubr.msk.f32.vlgmr.msra.gmra.mrb[0].mxu1 %vm320_vm0, %v5080_v5  ;;  %2608 = vmatprep.mubr.f32.mxu0 %v5412_v0 }
 0x106   : > { %4401 = vrot.lane.b32.xlu1 %v5529_v2, %s5436_s13  ;;  %2544 = vmatprep.subr.mxu0 %v5805_v13 }
 0x107   : > { %4409 = vrot.lane.b32.xlu0 %v5705_v10, %s5436_s13  ;;  %2679 = vmatprep.mubr.f32.mxu1 %v5412_v0 }
 0x108   : > { %v2531_v14 = vpop.permute.xlu1 %2530 }
 0x109   : > { %v2529_v15 = vpop.permute.xlu0 %2528 }
 0x10a   : > { %v5814_v16 = vsel %vm2532_vm13, %v2527_v11, %v2529_v15  ;;  %4575 = vrot.lane.b32.xlu1 %v5527_v1, %s5437_s22  ;;  %v5818_v17 = vsel %vm2532_vm13, %v2529_v15, %v2531_v14 }
 0x10b   : > { %4573 = vrot.lane.b32.xlu0 %v5536_v4, %s5437_s22  ;;  %2615 = vmatprep.subr.mxu1 %v5818_v17 }
 0x10c   : > { %2616 = vmatpush1.msra.mxu1 %v5814_v16  ;;  %v2695_v19 = vpop.permute.xlu1 %2694 }
 0x10d   : > { %v2523_v20 = vpop.permute.xlu0 %2522  ;;  %5085 = vmatmul.mubr.msk.f32.vlgmr.msra.gmra.mrb[0].mxu1 %vm320_vm0, %v5083_v18 }
 0x10e   : > { %v5828_v21 = vsel %vm2532_vm13, %v2523_v20, %v2525_v12  ;;  %4579 = vrot.lane.b32.xlu1 %v5705_v10, %s5437_s22  ;;  %2849 = vmatprep.mubr.f32.mxu1 %v5412_v0  ;;  %v5101_v20 = vld [vmem:[%s6020_s2 + $0x98] sm:$0xff] }
 0x10f   : > { %4577 = vrot.lane.b32.xlu0 %v5554_v6, %s5437_s22  ;;  %2545 = vmatpush1.msra.mxu0 %v5828_v21 }
 0x110   : > { %v2699_v22 = vpop.permute.xlu1 %2698  ;;  %5084 = vmatmul.mubr.msk.f32.vlgmr.msra.gmra.mrb[0].mxu0 %vm320_vm0, %v5083_v18 }
 0x111   : > { %v2697_v23 = vpop.permute.xlu0 %2696  ;;  %2778 = vmatprep.mubr.f32.mxu0 %v5412_v0 }
 0x112   : > { %4743 = vrot.lane.b32.xlu1 %v5536_v4, %s5438_s29  ;;  %v2704_v24 = vsel %vm2702_vm14, %v2695_v19, %v2697_v23  ;;  %v5086_v4 = vld [vmem:[%s6020_s2 + $0x70] sm:$0xff]  ;;  %v2705_v30 = vsel %vm2702_vm14, %v2697_v23, %v2699_v22 }
 0x113   : > { %4571 = vrot.lane.b32.xlu0 %v5529_v2, %s5437_s22  ;;  %2714 = vmatprep.subr.mxu0 %v2704_v24  ;;  %s261_s22 = sand.u32 1, %s5394_s16  }
 0x114   : > { %v2693_v26 = vpop.permute.xlu1 %2692  ;;  %s5039_s24 = sshll.u32 %s261_s22, 5  ;;  %s4922_s18 = scalar_lea.sflag [#allocation4], %s261_s22 }
 0x115   : > { %v2703_v27 = vsel %vm2702_vm14, %v2693_v26, %v2695_v19  ;;  %v2701_v28 = vpop.permute.xlu0 %2700 }
 0x116   : > { %4747 = vrot.lane.b32.xlu1 %v5554_v6, %s5438_s29  ;;  %2715 = vmatpush1.msra.mxu0 %v2703_v27  ;;  %v2706_v29 = vsel %vm2702_vm14, %v2699_v22, %v2701_v28 }
 0x117   : > { %4745 = vrot.lane.b32.xlu0 %v5527_v1, %s5438_s29  ;;  %2785 = vmatprep.subr.mxu1 %v2706_v29 }
 0x118   : > { %2786 = vmatpush1.msra.mxu1 %v2705_v30  ;;  %v2867_v31 = vpop.permute.xlu1 %2866  ;;  %5087 = vmatmul.mubr.msk.f32.vlgmr.msra.gmra.mrb[0].mxu0 %vm320_vm0, %v5086_v4 }
 0x119   : > { %v2865_v32 = vpop.permute.xlu0 %2864  ;;  %5088 = vmatmul.mubr.msk.f32.vlgmr.msra.gmra.mrb[0].mxu1 %vm320_vm0, %v5086_v4  ;;  %2947 = vmatprep.mubr.f32.mxu0 %v5412_v0 }
 0x11a   : > { %4741 = vrot.lane.b32.xlu1 %v5529_v2, %s5438_s29  ;;  %v2873_v6 = vsel %vm320_vm0, %v2865_v32, %v2867_v31  ;;  %3018 = vmatprep.mubr.f32.mxu1 %v5412_v0  ;;  %v5089_v2 = vld [vmem:[%s6020_s2 + $0x78] sm:$0xff] }
 0x11b   : > { %4749 = vrot.lane.b32.xlu0 %v5705_v10, %s5438_s29  ;;  %2883 = vmatprep.subr.mxu0 %v2873_v6  ;;  %s263_s29 = scalar_lea.vmem [#allocation3], %s5039_s24 }
 0x11c   : > { %v2871_v1 = vpop.permute.xlu1 %2870  ;;  %s4938_s30 = sshll.u32 %s263_s29, 4  ;;  %s5973_s30 = int_to_ptr.vmem [resolvable:$true] %s4938_s30 }
 0x11d   : > { %v2869_v34 = vpop.permute.xlu0 %2868  ;;  %s5332_s8 = scalar_lea.vmem %s5973_s30, 512  ;;  %p5339_p2 = scmp.lt.s32.totalorder %s5973_s30, %s5337_s10 }
 0x11e   : > { %v2874_v35 = vsel %vm320_vm0, %v2867_v31, %v2869_v34  ;;  %v2875_v36 = vsel %vm320_vm0, %v2869_v34, %v2871_v1  ;;  %v5104_v31 = vld [vmem:[%s6020_s2 + $0xa0] sm:$0xff]  ;;  %p5333_p13 = scmp.ne.s32.totalorder %s5973_s30, %s5332_s8  ;;  %p5340_p3 = scmp.lt.s32.totalorder %s5338_s11, %s5332_s8 }
 0x11f   : > { %2954 = vmatprep.subr.mxu1 %v2875_v36  ;;  %312 = vperm.xlu0 %5331, %v309_v33  }
 0x120   : > { %2955 = vmatpush1.msra.mxu1 %v2874_v35  ;;  %v3034_v37 = vpop.permute.xlu1 %3033  ;;  %p5334_p0 = pnand %p5333_p13, %p5506_p4  ;;  %p5341_p5 = por %p5340_p3, %p5339_p2 }
 0x121   : > { %v2863_v10 = vpop.permute.xlu0 %2862  ;;  %5091 = vmatmul.mubr.msk.f32.vlgmr.msra.gmra.mrb[0].mxu1 %vm320_vm0, %v5089_v2 }
 0x122   : > { %v2872_v38 = vsel %vm320_vm0, %v2863_v10, %v2865_v32  ;;  %3188 = vmatprep.mubr.f32.mxu1 %v5412_v0  ;;  %p5335_p1 = pneg %p5334_p0 }
 0x123   : > { %2884 = vmatpush1.msra.mxu0 %v2872_v38 }
 0x124   : > { %v3038_v39 = vpop.permute.xlu1 %3037  ;;  %5090 = vmatmul.mubr.msk.f32.vlgmr.msra.gmra.mrb[0].mxu0 %vm320_vm0, %v5089_v2  ;;  %p5342_p6 = pnand %p5341_p5, %p5335_p1 }
 0x125   : > { %v3036_v40 = vpop.permute.xlu0 %3035  ;;  %3117 = vmatprep.mubr.f32.mxu0 %v5412_v0 }
 0x126   : > { %v3043_v41 = vsel %vm3041_vm15, %v3034_v37, %v3036_v40  ;;  %v3044_v47 = vsel %vm3041_vm15, %v3036_v40, %v3038_v39 }
 0x127   : > { %3053 = vmatprep.subr.mxu0 %v3043_v41 }
 0x128   : > { %v3032_v42 = vpop.permute.xlu1 %3031 }
 0x129   : > { %v3042_v43 = vsel %vm3041_vm15, %v3032_v42, %v3034_v37  ;;  %v3040_v44 = vpop.permute.xlu0 %3039  ;;  %v5107_v37 = vld [vmem:[%s6020_s2 + $0xa8] sm:$0xff] }
 0x12a   : > { %3054 = vmatpush1.msra.mxu0 %v3042_v43  ;;  %v3045_v45 = vsel %vm3041_vm15, %v3038_v39, %v3040_v44 }
 0x12b   : > { %3124 = vmatprep.subr.mxu1 %v3045_v45 }
 0x12c   : > { %3125 = vmatpush1.msra.mxu1 %v3044_v47  ;;  %v3206_v48 = vpop.permute.xlu1 %3205  ;;  %5093 = vmatmul.mubr.msk.f32.vlgmr.msra.gmra.mrb[0].mxu0 %vm320_vm0, %v5092_v46 }
 0x12d   : > { %v3204_v49 = vpop.permute.xlu0 %3203  ;;  %5094 = vmatmul.mubr.msk.f32.vlgmr.msra.gmra.mrb[0].mxu1 %vm320_vm0, %v5092_v46  ;;  %3287 = vmatprep.mubr.f32.mxu0 %v5412_v0  ;;  %v5110_v46 = vld [vmem:[%s6020_s2 + $0xb0] sm:$0xff] }
 0x12e   : > { %v3213_v50 = vsel %vm3211_vm1, %v3204_v49, %v3206_v48  ;;  %3358 = vmatprep.mubr.f32.mxu1 %v5412_v0 }
 0x12f   : > { %3223 = vmatprep.subr.mxu0 %v3213_v50 }
 0x130   : > { %v3210_v51 = vpop.permute.xlu1 %3209 }
 0x131   : > { %v3208_v52 = vpop.permute.xlu0 %3207 }
 0x132   : > { %v3214_v53 = vsel %vm3211_vm1, %v3206_v48, %v3208_v52  ;;  %v3215_v54 = vsel %vm3211_vm1, %v3208_v52, %v3210_v51 }
 0x133   : > { %3294 = vmatprep.subr.mxu1 %v3215_v54 }
 0x134   : > { %3295 = vmatpush1.msra.mxu1 %v3214_v53  ;;  %v3384_v56 = vpop.permute.xlu1 %3383 }
 0x135   : > { %v3202_v57 = vpop.permute.xlu0 %3201  ;;  %5097 = vmatmul.mubr.msk.f32.vlgmr.msra.gmra.mrb[0].mxu1 %vm320_vm0, %v5095_v55 }
 0x136   : > { %v3212_v58 = vsel %vm3211_vm1, %v3202_v57, %v3204_v49  ;;  %3538 = vmatprep.mubr.f32.mxu1 %v5412_v0 }
 0x137   : > { %3224 = vmatpush1.msra.mxu0 %v3212_v58 }
 0x138   : > { %v3388_v59 = vpop.permute.xlu1 %3387  ;;  %5096 = vmatmul.mubr.msk.f32.vlgmr.msra.gmra.mrb[0].mxu0 %vm320_vm0, %v5095_v55 }
 0x139   : > { %v3386_v60 = vpop.permute.xlu0 %3385  ;;  %3467 = vmatprep.mubr.f32.mxu0 %v5412_v0 }
 0x13a   : > { %v3393_v61 = vsel %vm3391_vm2, %v3384_v56, %v3386_v60  ;;  %v3394_v5 = vsel %vm3391_vm2, %v3386_v60, %v3388_v59 }
 0x13b   : > { %3403 = vmatprep.subr.mxu0 %v3393_v61 }
 0x13c   : > { %v3382_v62 = vpop.permute.xlu1 %3381 }
 0x13d   : > { %v3392_v63 = vsel %vm3391_vm2, %v3382_v62, %v3384_v56  ;;  %v3390_v3 = vpop.permute.xlu0 %3389  ;;  %v5113_v56 = vld [vmem:[%s6020_s2 + $0xb8] sm:$0xff] }
 0x13e   : > { %3404 = vmatpush1.msra.mxu0 %v3392_v63  ;;  %v3395_v7 = vsel %vm3391_vm2, %v3388_v59, %v3390_v3 }
 0x13f   : > { %3474 = vmatprep.subr.mxu1 %v3395_v7 }
 0x140   : > { %3475 = vmatpush1.msra.mxu1 %v3394_v5  ;;  %v3556_v9 = vpop.permute.xlu1 %3555  ;;  %5099 = vmatmul.mubr.msk.f32.vlgmr.msra.gmra.mrb[0].mxu0 %vm320_vm0, %v5098_v8 }
 0x141   : > { %v3554_v11 = vpop.permute.xlu0 %3553  ;;  %5100 = vmatmul.mubr.msk.f32.vlgmr.msra.gmra.mrb[0].mxu1 %vm320_vm0, %v5098_v8  ;;  %3637 = vmatprep.mubr.f32.mxu0 %v5412_v0  ;;  %v5116_v8 = vld [vmem:[%s6020_s2 + $0xc0] sm:$0xff] }
 0x142   : > { %v3563_v12 = vsel %vm3561_vm3, %v3554_v11, %v3556_v9  ;;  %3708 = vmatprep.mubr.f32.mxu1 %v5412_v0 }
 0x143   : > { %3573 = vmatprep.subr.mxu0 %v3563_v12 }
 0x144   : > { %v3560_v14 = vpop.permute.xlu1 %3559 }
 0x145   : > { %v3558_v15 = vpop.permute.xlu0 %3557 }
 0x146   : > { %v3564_v18 = vsel %vm3561_vm3, %v3556_v9, %v3558_v15  ;;  %v3565_v19 = vsel %vm3561_vm3, %v3558_v15, %v3560_v14 }
 0x147   : > { %3644 = vmatprep.subr.mxu1 %v3565_v19 }
 0x148   : > { %3645 = vmatpush1.msra.mxu1 %v3564_v18  ;;  %v3724_v22 = vpop.permute.xlu1 %3723 }
 0x149   : > { %v3552_v23 = vpop.permute.xlu0 %3551  ;;  %5103 = vmatmul.mubr.msk.f32.vlgmr.msra.gmra.mrb[0].mxu1 %vm320_vm0, %v5101_v20 }
 0x14a   : > { %v3562_v24 = vsel %vm3561_vm3, %v3552_v23, %v3554_v11  ;;  %3878 = vmatprep.mubr.f32.mxu1 %v5412_v0 }
 0x14b   : > { %3574 = vmatpush1.msra.mxu0 %v3562_v24 }
 0x14c   : > { %v3728_v25 = vpop.permute.xlu1 %3727  ;;  %5102 = vmatmul.mubr.msk.f32.vlgmr.msra.gmra.mrb[0].mxu0 %vm320_vm0, %v5101_v20 }
 0x14d   : > { %v3726_v26 = vpop.permute.xlu0 %3725  ;;  %3807 = vmatprep.mubr.f32.mxu0 %v5412_v0 }
 0x14e   : > { %v3733_v27 = vsel %vm3731_vm4, %v3724_v22, %v3726_v26  ;;  %v3734_v32 = vsel %vm3731_vm4, %v3726_v26, %v3728_v25 }
 0x14f   : > { %3743 = vmatprep.subr.mxu0 %v3733_v27 }
 0x150   : > { %v3722_v28 = vpop.permute.xlu1 %3721 }
 0x151   : > { %v3732_v29 = vsel %vm3731_vm4, %v3722_v28, %v3724_v22  ;;  %v3730_v4 = vpop.permute.xlu0 %3729  ;;  %v5119_v22 = vld [vmem:[%s6020_s2 + $0xc8] sm:$0xff] }
 0x152   : > { %3744 = vmatpush1.msra.mxu0 %v3732_v29  ;;  %v3735_v30 = vsel %vm3731_vm4, %v3728_v25, %v3730_v4 }
 0x153   : > { %3814 = vmatprep.subr.mxu1 %v3735_v30 }
 0x154   : > { %3815 = vmatpush1.msra.mxu1 %v3734_v32  ;;  %v3896_v6 = vpop.permute.xlu1 %3895  ;;  %5105 = vmatmul.mubr.msk.f32.vlgmr.msra.gmra.mrb[0].mxu0 %vm320_vm0, %v5104_v31 }
 0x155   : > { %v3894_v1 = vpop.permute.xlu0 %3893  ;;  %5106 = vmatmul.mubr.msk.f32.vlgmr.msra.gmra.mrb[0].mxu1 %vm320_vm0, %v5104_v31  ;;  %3977 = vmatprep.mubr.f32.mxu0 %v5412_v0  ;;  %v5122_v31 = vld [vmem:[%s6020_s2 + $0xd0] sm:$0xff] }
 0x156   : > { %v3903_v33 = vsel %vm3901_vm5, %v3894_v1, %v3896_v6  ;;  %4048 = vmatprep.mubr.f32.mxu1 %v5412_v0 }
 0x157   : > { %3913 = vmatprep.subr.mxu0 %v3903_v33 }
 0x158   : > { %v3900_v34 = vpop.permute.xlu1 %3899 }
 0x159   : > { %v3898_v35 = vpop.permute.xlu0 %3897 }
 0x15a   : > { %v3904_v36 = vsel %vm3901_vm5, %v3896_v6, %v3898_v35  ;;  %v3905_v2 = vsel %vm3901_vm5, %v3898_v35, %v3900_v34 }
 0x15b   : > { %3984 = vmatprep.subr.mxu1 %v3905_v2 }
 0x15c   : > { %3985 = vmatpush1.msra.mxu1 %v3904_v36  ;;  %v4064_v10 = vpop.permute.xlu1 %4063 }
 0x15d   : > { %v3892_v38 = vpop.permute.xlu0 %3891  ;;  %5109 = vmatmul.mubr.msk.f32.vlgmr.msra.gmra.mrb[0].mxu1 %vm320_vm0, %v5107_v37 }
 0x15e   : > { %v3902_v39 = vsel %vm3901_vm5, %v3892_v38, %v3894_v1  ;;  %4218 = vmatprep.mubr.f32.mxu1 %v5412_v0 }
 0x15f   : > { %3914 = vmatpush1.msra.mxu0 %v3902_v39 }
 0x160   : > { %v4068_v40 = vpop.permute.xlu1 %4067  ;;  %5108 = vmatmul.mubr.msk.f32.vlgmr.msra.gmra.mrb[0].mxu0 %vm320_vm0, %v5107_v37 }
 0x161   : > { %v4066_v41 = vpop.permute.xlu0 %4065  ;;  %4147 = vmatprep.mubr.f32.mxu0 %v5412_v0 }
 0x162   : > { %v4073_v42 = vsel %vm4071_vm6, %v4064_v10, %v4066_v41  ;;  %v4074_v48 = vsel %vm4071_vm6, %v4066_v41, %v4068_v40 }
 0x163   : > { %4083 = vmatprep.subr.mxu0 %v4073_v42 }
 0x164   : > { %v4062_v43 = vpop.permute.xlu1 %4061 }
 0x165   : > { %v4072_v44 = vsel %vm4071_vm6, %v4062_v43, %v4064_v10  ;;  %v4070_v45 = vpop.permute.xlu0 %4069 }
 0x166   : > { %4084 = vmatpush1.msra.mxu0 %v4072_v44  ;;  %v4075_v47 = vsel %vm4071_vm6, %v4068_v40, %v4070_v45 }
 0x167   : > { %4154 = vmatprep.subr.mxu1 %v4075_v47 }
 0x168   : > { %4155 = vmatpush1.msra.mxu1 %v4074_v48  ;;  %v4236_v49 = vpop.permute.xlu1 %4235  ;;  %5111 = vmatmul.mubr.msk.f32.vlgmr.msra.gmra.mrb[0].mxu0 %vm320_vm0, %v5110_v46 }
 0x169   : > { %v4234_v50 = vpop.permute.xlu0 %4233  ;;  %5112 = vmatmul.mubr.msk.f32.vlgmr.msra.gmra.mrb[0].mxu1 %vm320_vm0, %v5110_v46  ;;  %4317 = vmatprep.mubr.f32.mxu0 %v5412_v0 }
 0x16a   : > { %v4243_v51 = vsel %vm4241_vm7, %v4234_v50, %v4236_v49  ;;  %4388 = vmatprep.mubr.f32.mxu1 %v5412_v0 }
 0x16b   : > { %4253 = vmatprep.subr.mxu0 %v4243_v51 }
 0x16c   : > { %v4240_v52 = vpop.permute.xlu1 %4239 }
 0x16d   : > { %v4238_v53 = vpop.permute.xlu0 %4237 }
 0x16e   : > { %v4244_v54 = vsel %vm4241_vm7, %v4236_v49, %v4238_v53  ;;  %v4245_v55 = vsel %vm4241_vm7, %v4238_v53, %v4240_v52 }
 0x16f   : > { %4324 = vmatprep.subr.mxu1 %v4245_v55 }
 0x170   : > { %4325 = vmatpush1.msra.mxu1 %v4244_v54  ;;  %v4404_v57 = vpop.permute.xlu1 %4403 }
 0x171   : > { %v4232_v58 = vpop.permute.xlu0 %4231  ;;  %5115 = vmatmul.mubr.msk.f32.vlgmr.msra.gmra.mrb[0].mxu1 %vm320_vm0, %v5113_v56 }
 0x172   : > { %v4242_v59 = vsel %vm4241_vm7, %v4232_v58, %v4234_v50  ;;  %4558 = vmatprep.mubr.f32.mxu1 %v5412_v0 }
 0x173   : > { %4254 = vmatpush1.msra.mxu0 %v4242_v59 }
 0x174   : > { %v4408_v60 = vpop.permute.xlu1 %4407  ;;  %5114 = vmatmul.mubr.msk.f32.vlgmr.msra.gmra.mrb[0].mxu0 %vm320_vm0, %v5113_v56 }
 0x175   : > { %v4406_v61 = vpop.permute.xlu0 %4405  ;;  %4487 = vmatprep.mubr.f32.mxu0 %v5412_v0 }
 0x176   : > { %v4413_v62 = vsel %vm4411_vm8, %v4404_v57, %v4406_v61  ;;  %v4414_v9 = vsel %vm4411_vm8, %v4406_v61, %v4408_v60 }
 0x177   : > { %4423 = vmatprep.subr.mxu0 %v4413_v62 }
 0x178   : > { %v4402_v63 = vpop.permute.xlu1 %4401 }
 0x179   : > { %v4412_v3 = vsel %vm4411_vm8, %v4402_v63, %v4404_v57  ;;  %v4410_v7 = vpop.permute.xlu0 %4409 }
 0x17a   : > { %4424 = vmatpush1.msra.mxu0 %v4412_v3  ;;  %v4415_v5 = vsel %vm4411_vm8, %v4408_v60, %v4410_v7 }
 0x17b   : > { %4494 = vmatprep.subr.mxu1 %v4415_v5 }
 0x17c   : > { %4495 = vmatpush1.msra.mxu1 %v4414_v9  ;;  %v4576_v11 = vpop.permute.xlu1 %4575  ;;  %5117 = vmatmul.mubr.msk.f32.vlgmr.msra.gmra.mrb[0].mxu0 %vm320_vm0, %v5116_v8 }
 0x17d   : > { %v4574_v12 = vpop.permute.xlu0 %4573  ;;  %5118 = vmatmul.mubr.msk.f32.vlgmr.msra.gmra.mrb[0].mxu1 %vm320_vm0, %v5116_v8  ;;  %4657 = vmatprep.mubr.f32.mxu0 %v5412_v0 }
 0x17e   : > { %v4583_v14 = vsel %vm4581_vm9, %v4574_v12, %v4576_v11  ;;  %4728 = vmatprep.mubr.f32.mxu1 %v5412_v0 }
 0x17f   : > { %4593 = vmatprep.subr.mxu0 %v4583_v14 }
 0x180   : > { %v4580_v15 = vpop.permute.xlu1 %4579 }
 0x181   : > { %v4578_v18 = vpop.permute.xlu0 %4577 }
 0x182   : > { %v4584_v19 = vsel %vm4581_vm9, %v4576_v11, %v4578_v18  ;;  %v4585_v20 = vsel %vm4581_vm9, %v4578_v18, %v4580_v15 }
 0x183   : > { %4664 = vmatprep.subr.mxu1 %v4585_v20 }
 0x184   : > { %4665 = vmatpush1.msra.mxu1 %v4584_v19  ;;  %v4744_v23 = vpop.permute.xlu1 %4743 }
 0x185   : > { %v4572_v24 = vpop.permute.xlu0 %4571  ;;  %5121 = vmatmul.mubr.msk.f32.vlgmr.msra.gmra.mrb[0].mxu1 %vm320_vm0, %v5119_v22 }
 0x186   : > { %v4582_v25 = vsel %vm4581_vm9, %v4572_v24, %v4574_v12  ;;  %4898 = vmatprep.mubr.f32.mxu1 %v5412_v0 }
 0x187   : > { %4594 = vmatpush1.msra.mxu0 %v4582_v25 }
 0x188   : > { %5120 = vmatmul.mubr.msk.f32.vlgmr.msra.gmra.mrb[0].mxu0 %vm320_vm0, %v5119_v22  ;;  %v4748_v26 = vpop.permute.xlu1 %4747 }
 0x189   : > { %v4746_v27 = vpop.permute.xlu0 %4745  ;;  %4827 = vmatprep.mubr.f32.mxu0 %v5412_v0 }
 0x18a   : > { %v4753_v28 = vsel %vm4751_vm10, %v4744_v23, %v4746_v27  ;;  %v4754_v6 = vsel %vm4751_vm10, %v4746_v27, %v4748_v26 }
 0x18b   : > { %4763 = vmatprep.subr.mxu0 %v4753_v28 }
 0x18c   : > { %v4742_v29 = vpop.permute.xlu1 %4741 }
 0x18d   : > { %v4752_v4 = vsel %vm4751_vm10, %v4742_v29, %v4744_v23  ;;  %v4750_v30 = vpop.permute.xlu0 %4749 }
 0x18e   : > { %4764 = vmatpush1.msra.mxu0 %v4752_v4  ;;  %v4755_v32 = vsel %vm4751_vm10, %v4748_v26, %v4750_v30 }
 0x18f   : > { %4834 = vmatprep.subr.mxu1 %v4755_v32 }
 0x190   : > { %5123 = vmatmul.mubr.msk.f32.vlgmr.msra.gmra.mrb[0].mxu0 %vm320_vm0, %v5122_v31  ;;  %4835 = vmatpush1.msra.mxu1 %v4754_v6 }
 0x191   : > { %5124 = vmatmul.mubr.msk.f32.vlgmr.msra.gmra.mrb[0].mxu1 %vm320_vm0, %v5122_v31 }
 0x19e   : > { %v313_v0 = vpop.permute.xlu0 %312 }
 0x263   : > { %v4829_v1 = vpop.f32.mrb[0].mxu0 }
 0x264   : > { %v5140_v33 = vadd.f32 %v4829_v1, %v313_v0  ;;  %v4831_v34 = vpop.f32.mrb[1].mxu0  ;;  %v4900_v35 = vpop.f32.mrb[0].mxu1 }
 0x265   : > { %v5141_v36 = vadd.f32 %v4831_v34, %v313_v0  ;;  %v5142_v2 = vadd.f32 %v4900_v35, %v313_v0  ;;  %v4902_v37 = vpop.f32.mrb[1].mxu1 }
 0x266   : > { %v4909_v10 = vadd.f32 %v5140_v33, %v5828_v21  ;;  %v5143_v38 = vadd.f32 %v4902_v37, %v313_v0 }
 0x267   : > { %v4910_v39 = vadd.f32 %v5141_v36, %v5805_v13  ;;  %v4911_v40 = vadd.f32 %v5142_v2, %v5814_v16 }
 0x268   : > { %v4913_v41 = vmax.f32 %v4909_v10, 0.0  ;;  %v4912_v42 = vadd.f32 %v5143_v38, %v5818_v17 }
 0x269   : > { %v4914_v43 = vmax.f32 %v4910_v39, 0.0  ;;  %v4915_v44 = vmax.f32 %v4911_v40, 0.0 }
 0x26a   : > { %4917 = vst [vmem:[%s263_s29] sm:$0xff] %v4913_v41  ;;  %v4916_v45 = vmax.f32 %v4912_v42, 0.0 }
 0x26b   : > { %4918 = vst [vmem:[%s263_s29 + $0x8] sm:$0xff] %v4914_v43  ;;  %4919 = vst [vmem:[%s263_s29 + $0x10] sm:$0xff] %v4915_v44 }
 0x26c   : > { %4920 = vst [vmem:[%s263_s29 + $0x18] sm:$0xff] %v4916_v45 }
 0x26d   : > { %5345 = shalt.err (!%p5342_p6)
}
 0x26e   : > { %s5346_s12 = scalar_lea.hbm %s5971_s7, 512  ;;  %s5350_s14 = scalar_lea.hbm %s6022_s4, 1024 }
 0x26f   : > { %p5347_p7 = scmp.ne.s32.totalorder %s5971_s7, %s5346_s12  ;;  %p5351_p11 = scmp.lt.u32.totalorder %s5971_s7, %s6022_s4 }
 0x270   : > { %p5352_p12 = scmp.lt.u32.totalorder %s5350_s14, %s5346_s12  ;;  %p5354_p0 = scmp.lt.u32.totalorder %s5346_s12, %s5971_s7 }
 0x271   : > { %p5348_p9 = pnand %p5347_p7, %p5506_p4 }
 0x272   : > { %p5353_p13 = por %p5352_p12, %p5351_p11 }
 0x273   : > { %p5349_p10 = pneg %p5348_p9 }
 0x274   : > { %p5355_p1 = por %p5354_p0, %p5353_p13 }
 0x276   : > { %p5356_p2 = pnand %p5355_p1, %p5349_p10 }
 0x278   : > { %5359 = shalt.err (!%p5356_p2)
}
 0x279   : > { %5248 = dma.vmem_to_hbm [thread:$0]  (%p5506_p4), %s5973_s30, 512, %s5971_s7, %s4922_s18  }
 0x27a PF: > { %p5254_p3 = scmp.ge.s32.totalorder %s5410_s20, 2  ;;  %s4950_s26 = sand.u32 1, %s5390_s15  }
 0x27b   : > { %s4951_s29 = scalar_lea.sflag [#allocation4], %s4950_s26 }
 0x27c   : > { %p5251_p5 = pnand %p5254_p3, %p5513_p8 }
 0x27e   : > { %5385 = dma.done.wait (!%p5251_p5), %s4951_s29, 512  }
 0x27f   : > { %5387 = vsyncadd (!%p5251_p5), %s4951_s29, 4294966784  ;;  %s17_s20 = sadd.s32 1, %s5410_s20   ;;  %s6025_s15 = smov %s5394_s16 }
 0x280   : > { %p14_p6 = scmp.ge.s32.totalorder %s17_s20, 4   ;;  %s6026_s16 = smov %s5398_s17 }
 0x281   : > { %s6027_s17 = smov %s5519_s28  ;;  %s6028_s18 = smov %s5406_s19 }
 0x282   : > { %s6029_s19 = smov %s6031_s23  ;;  %16 = sbr.rel (!%p14_p6) target bundleno = 4 (0x4), region = 100 }
 0x289   :  { %4956 = vsyncpa [#allocation4], 1 }
 0x28a   :  { %4958 = vsyncpa [#allocation4 + $0x1], 1 }

</bundles_post_ra>
